<compile_context>
chip_gen: v6e
topology: v6e:2x2x1
jax: 0.10.0
libtpu: 0.0.40
codegen_flags: <defaults>
</compile_context>

<pallas_src>
import functools

import jax
import jax.numpy as jnp
import numpy as np
from jax.experimental import pallas as pl
from jax.experimental.pallas import tpu as pltpu


def _discriminator_kernel(x_ref, mcode_ref, wrow_ref, w_ref, b_ref, out_ref, *,
                          temperature, eps, n_skill, pack_width,
                          traj_len, padded_traj_len, num_traj, use_bf16_exp):
    f32 = jnp.float32
    bf16 = jnp.bfloat16
    H = pack_width

    # ---- MLP: (Linear + ReLU) x 3, final Linear (num_layers = 4) ----
    # Packed weights: bf16 MXU inputs, f32 accumulation; biases f32.
    b = b_ref[...]                                                # (4, H) f32
    h = x_ref[...]                                                # (Bp, H) bf16 (zero-padded cols)
    for l in range(3):
        w_l = w_ref[l * H:(l + 1) * H, :]                         # static 8-aligned slice
        h = jnp.dot(h, w_l, preferred_element_type=f32) + b[l:l + 1, :]
        h = jnp.maximum(h, 0.0).astype(bf16)
    feats = (jnp.dot(h, w_ref[3 * H:4 * H, :], preferred_element_type=f32)
             + b[3:4, :])[:, :n_skill]                            # (Bp, n) f32

    # ---- F.normalize(features, dim=1): rsqrt on the EUP, no VPU divide ----
    sumsq = jnp.sum(feats * feats, axis=1, keepdims=True)
    f = feats * jax.lax.rsqrt(jnp.maximum(sumsq, 1e-24))          # (Bp, n) f32

    # ---- similarity (bf16 MXU inputs, f32 accumulation) ----
    fb = f.astype(bf16)
    scaled = jax.lax.dot_general(fb, fb, (((1,), (1,)), ((), ())),
                                 preferred_element_type=f32) * (1.0 / temperature)

    # ---- decode the single bf16 mask code: -1 masked, 0 same-skill, 1 negative ----
    m = mcode_ref[...]                                            # (Bp, Bp) bf16
    maskadd = jnp.minimum(m, 0.0) * 1e30                          # ~-1e30 on diag/padded cols
    neq = jnp.maximum(m, 0.0)                                     # 0/1 negatives mask (bf16)

    # Row max over valid off-diagonal columns only (exp is never applied to maskadd).
    rowmax = jnp.max(scaled + maskadd, axis=1, keepdims=True)
    shift = scaled - rowmax

    # ---- negatives: exp (bf16 on v6e/v7x) * neq, row-sum on the idle MXU ----
    if use_bf16_exp:
        masked = jnp.exp(shift.astype(bf16)) * neq                # bf16
    else:
        masked = jnp.exp(shift) * neq                             # f32 (v5e: no bf16 EUP)
    ones_col = jnp.ones((masked.shape[1], 1), masked.dtype)
    negatives = jnp.dot(masked, ones_col,
                        preferred_element_type=f32)               # (Bp, 1) f32

    # ---- positives + loss, per trajectory (static unroll; blocks are
    #      padded_traj_len = 64 rows, sublane aligned). Harmless at num_traj=2. ----
    wrow = wrow_ref[...]                                          # (Bp, 1) valid/B weights
    total = jnp.zeros((1, 1), f32)
    for t in range(num_traj):
        lo = t * padded_traj_len
        f_t = f[lo:lo + padded_traj_len, :]                       # (Tp, n)
        # another_positive: last VALID step of this trajectory, broadcast over rows
        ap_t = f[lo + traj_len - 1:lo + traj_len, :]              # (1, n)
        pos_t = jnp.sum(jnp.exp(f_t * ap_t), axis=1, keepdims=True)   # (Tp, 1)
        neg_t = negatives[lo:lo + padded_traj_len, :]
        w_t = wrow[lo:lo + padded_traj_len, :]
        ratio = pos_t * pl.reciprocal(neg_t + eps, approx=True)   # EUP reciprocal
        loss_t = -jnp.log(ratio + eps)
        total = total + jnp.sum(loss_t * w_t, axis=0, keepdims=True)

    out_ref[...] = total                                          # already mean over true B


def make_discriminator_loss(skills, params, *, traj_len, temperature=0.5, eps=1e-6):
    """Build all constants once (masks, weights, packing) and return a jitted loss(x)."""
    skills_np = np.asarray(jax.device_get(skills)).astype(np.int64)
    B = skills_np.shape[0]
    assert B % traj_len == 0
    num_traj = B // traj_len

    # Pad each trajectory to a sublane multiple; bump further so the padded
    # batch fills full 128-lane rows when that is cheap (50 -> 64, Bp = 128).
    Tp = -(-traj_len // 8) * 8
    Bp = num_traj * Tp
    if Bp % 128 != 0:
        target = -(-Bp // 128) * 128
        if target % num_traj == 0 and target // num_traj >= traj_len:
            Tp = target // num_traj
            Bp = target
    pad_t = Tp - traj_len

    w1, b1, w2, b2, w3, b3, w4, b4 = [np.asarray(jax.device_get(p), np.float32)
                                      for p in params]
    D, hidden = w1.shape
    n_skill = w4.shape[1]
    H = max(D, hidden, n_skill)                    # packing width (here = hidden = 32)

    # ---- packed weight / bias stacks (built once, bf16 / f32) ----
    wstack = np.zeros((4 * H, H), np.float32)
    wstack[0:D, 0:hidden] = w1
    wstack[H:H + hidden, 0:hidden] = w2
    wstack[2 * H:2 * H + hidden, 0:hidden] = w3
    wstack[3 * H:3 * H + hidden, 0:n_skill] = w4
    bstack = np.zeros((4, H), np.float32)
    bstack[0, :hidden], bstack[1, :hidden], bstack[2, :hidden] = b1, b2, b3
    bstack[3, :n_skill] = b4

    # ---- single (Bp,Bp) bf16 mask code + per-row mean weights (built once) ----
    sp = np.full((num_traj, Tp), -1, np.int64)
    sp[:, :traj_len] = skills_np.reshape(num_traj, traj_len)
    sp = sp.reshape(Bp)
    valid = np.zeros((num_traj, Tp), bool)
    valid[:, :traj_len] = True
    valid = valid.reshape(Bp)
    neq = (sp[None, :] != sp[:, None]) & valid[None, :] & valid[:, None]
    rowmax_ok = (~np.eye(Bp, dtype=bool)) & valid[None, :]
    # -1: excluded from row-max (diag / padded col); 0: valid same-skill; 1: negative.
    mcode = np.where(~rowmax_ok, -1.0, np.where(neq, 1.0, 0.0)).astype(np.float32)
    wrow = (valid.astype(np.float32) / float(B)).reshape(Bp, 1)

    mcode_dev = jnp.asarray(mcode, jnp.bfloat16)
    wrow_dev = jnp.asarray(wrow, jnp.float32)
    wstack_dev = jnp.asarray(wstack, jnp.bfloat16)
    bstack_dev = jnp.asarray(bstack, jnp.float32)

    # bf16 exp on chips with a bf16 EUP path (v6e / v7x); f32 otherwise (v5e and older).
    kind = jax.devices()[0].device_kind.lower()
    use_bf16_exp = any(tag in kind for tag in ("v6", "v7", "7x"))

    kernel = functools.partial(
        _discriminator_kernel,
        temperature=float(temperature), eps=float(eps),
        n_skill=int(n_skill), pack_width=int(H),
        traj_len=int(traj_len), padded_traj_len=int(Tp), num_traj=int(num_traj),
        use_bf16_exp=bool(use_bf16_exp))

    vmem = pl.BlockSpec(memory_space=pltpu.MemorySpace.VMEM)
    call = pl.pallas_call(
        kernel,
        out_shape=jax.ShapeDtypeStruct((1, 1), jnp.float32),
        in_specs=[vmem] * 5,
        out_specs=pl.BlockSpec(memory_space=pltpu.MemorySpace.VMEM),
    )

    @jax.jit
    def loss_fn(x):
        # Per-call work: pad per trajectory, pad feature columns to the packing
        # width, cast to bf16.  Everything else is a closed-over constant.
        x3 = jnp.pad(x.reshape(num_traj, traj_len, D), ((0, 0), (0, pad_t), (0, 0)))
        xp = jnp.pad(x3.reshape(Bp, D), ((0, 0), (0, H - D))).astype(jnp.bfloat16)
        out = call(xp, mcode_dev, wrow_dev, wstack_dev, bstack_dev)
        return out[0, 0]

    return loss_fn


def reference_loss(x, skills, params, traj_len, temperature=0.5, eps=1e-6):
    """Pure-JAX f32 mirror of the PyTorch forward (for correctness checking)."""
    w1, b1, w2, b2, w3, b3, w4, b4 = params
    hi = jax.lax.Precision.HIGHEST
    h = jax.nn.relu(jnp.dot(x, w1, precision=hi) + b1)
    h = jax.nn.relu(jnp.dot(h, w2, precision=hi) + b2)
    h = jax.nn.relu(jnp.dot(h, w3, precision=hi) + b3)
    feats = jnp.dot(h, w4, precision=hi) + b4
    f = feats / jnp.maximum(jnp.linalg.norm(feats, axis=1, keepdims=True), 1e-12)
    B, n_feat = f.shape
    sim = jnp.dot(f, f.T, precision=hi)
    eye = np.eye(B, dtype=bool)
    eq = (skills[None, :] == skills[:, None])
    eq_off = eq[~eye].reshape(B, B - 1)
    sim_off = sim[~eye].reshape(B, B - 1) / temperature
    sim_off = sim_off - sim_off.max(axis=1, keepdims=True)
    sim_off = jnp.exp(sim_off)
    ap = f.reshape(-1, traj_len, n_feat)[:, traj_len - 1, :]
    ap = jnp.repeat(ap, traj_len, axis=0)
    positives = jnp.sum(jnp.exp(f * ap), axis=-1, keepdims=True)
    negatives = jnp.sum(sim_off * (~eq_off).astype(jnp.float32), axis=-1, keepdims=True)
    loss = -jnp.log(positives / (negatives + eps) + eps)
    return jnp.mean(loss)


if __name__ == "__main__":
    key = jax.random.PRNGKey(0)
    n_skill, state_size, hidden = 6, 8, 32
    traj_len, num_traj = 50, 2          # matches hard-coded expand(50, ...) semantics
    B = num_traj * traj_len

    ks = jax.random.split(key, 8)
    x = jax.random.normal(ks[0], (B, state_size), jnp.float32)
    # distinct skills per trajectory so the negatives mask is exercised non-trivially
    skills_per_traj = jax.random.permutation(ks[1], n_skill)[:num_traj].astype(jnp.int32)
    skills = jnp.repeat(skills_per_traj, traj_len)

    def init_linear(k, fan_in, fan_out):
        kw, kb = jax.random.split(k)
        bound = 1.0 / np.sqrt(fan_in)
        w = jax.random.uniform(kw, (fan_in, fan_out), jnp.float32, -bound, bound)
        b = jax.random.uniform(kb, (fan_out,), jnp.float32, -bound, bound)
        return w, b

    w1, b1 = init_linear(ks[2], state_size, hidden)
    w2, b2 = init_linear(ks[3], hidden, hidden)
    w3, b3 = init_linear(ks[4], hidden, hidden)
    w4, b4 = init_linear(ks[5], hidden, n_skill)
    params = (w1, b1, w2, b2, w3, b3, w4, b4)

    # Constants (masks, packed/bf16 weights) are built once here, not per call.
    loss_fn = make_discriminator_loss(skills, params, traj_len=traj_len)
    out = jax.block_until_ready(loss_fn(x))

    ref = reference_loss(x, skills, params, traj_len)
    assert np.isfinite(float(out)), "kernel produced non-finite loss"
    # Kernel uses bf16 MXU inputs (f32 accumulation) and, on v6e/v7x, a bf16 exp;
    # the reference is pure f32 -> compare with a 5e-2 tolerance.
    np.testing.assert_allclose(float(out), float(ref), rtol=5e-2, atol=5e-2)
    print("KERNEL_OK")
</pallas_src>

<mosaic_0001>
module attributes {stable_mosaic.version = 11 : i64} {
  func.func @_discriminator_kernel(%arg0: memref<128x32xbf16, #tpu.memory_space<vmem>>, %arg1: memref<128x128xbf16, #tpu.memory_space<vmem>>, %arg2: memref<128x1xf32, #tpu.memory_space<vmem>>, %arg3: memref<128x32xbf16, #tpu.memory_space<vmem>>, %arg4: memref<4x32xf32, #tpu.memory_space<vmem>>, %arg5: memref<1x1xf32, #tpu.memory_space<vmem>>) attributes {dimension_semantics = [], scalar_prefetch = 0 : i64, scratch_operands = 0 : i64, tpu.core_type = #tpu.core_type<tc>} {
    %c0 = arith.constant 0 : index
    %c0_0 = arith.constant 0 : index
    %0 = vector.load %arg4[%c0, %c0_0] : memref<4x32xf32, #tpu.memory_space<vmem>>, vector<4x32xf32>
    %c0_1 = arith.constant 0 : index
    %c0_2 = arith.constant 0 : index
    %1 = vector.load %arg0[%c0_1, %c0_2] : memref<128x32xbf16, #tpu.memory_space<vmem>>, vector<128x32xbf16>
    %c0_3 = arith.constant 0 : index
    %c0_4 = arith.constant 0 : index
    %2 = vector.load %arg3[%c0_3, %c0_4] : memref<128x32xbf16, #tpu.memory_space<vmem>>, vector<32x32xbf16>
    %cst = arith.constant dense<0.000000e+00> : vector<128x32xf32>
    %3 = tpu.matmul %1, %2, %cst {dimension_numbers = #tpu.dot_dimension_numbers<[1], [0], [0], [1], [0, 0, 1, 1], [], []>} : vector<128x32xbf16>, vector<32x32xbf16>, vector<128x32xf32> -> vector<128x32xf32>
    %4 = vector.extract_strided_slice %0 {offsets = [0, 0], sizes = [1, 32], strides = [1, 1]} : vector<4x32xf32> to vector<1x32xf32>
    %5 = vector.broadcast %4 : vector<1x32xf32> to vector<128x32xf32>
    %6 = arith.addf %3, %5 : vector<128x32xf32>
    %cst_5 = arith.constant 0.000000e+00 : f32
    %7 = vector.broadcast %cst_5 : f32 to vector<128x32xf32>
    %8 = arith.maximumf %6, %7 : vector<128x32xf32>
    %9 = arith.truncf %8 : vector<128x32xf32> to vector<128x32xbf16>
    %c32 = arith.constant 32 : index
    %c0_6 = arith.constant 0 : index
    %10 = vector.load %arg3[%c32, %c0_6] : memref<128x32xbf16, #tpu.memory_space<vmem>>, vector<32x32xbf16>
    %cst_7 = arith.constant dense<0.000000e+00> : vector<128x32xf32>
    %11 = tpu.matmul %9, %10, %cst_7 {dimension_numbers = #tpu.dot_dimension_numbers<[1], [0], [0], [1], [0, 0, 1, 1], [], []>} : vector<128x32xbf16>, vector<32x32xbf16>, vector<128x32xf32> -> vector<128x32xf32>
    %12 = vector.extract_strided_slice %0 {offsets = [1, 0], sizes = [1, 32], strides = [1, 1]} : vector<4x32xf32> to vector<1x32xf32>
    %13 = vector.broadcast %12 : vector<1x32xf32> to vector<128x32xf32>
    %14 = arith.addf %11, %13 : vector<128x32xf32>
    %cst_8 = arith.constant 0.000000e+00 : f32
    %15 = vector.broadcast %cst_8 : f32 to vector<128x32xf32>
    %16 = arith.maximumf %14, %15 : vector<128x32xf32>
    %17 = arith.truncf %16 : vector<128x32xf32> to vector<128x32xbf16>
    %c64 = arith.constant 64 : index
    %c0_9 = arith.constant 0 : index
    %18 = vector.load %arg3[%c64, %c0_9] : memref<128x32xbf16, #tpu.memory_space<vmem>>, vector<32x32xbf16>
    %cst_10 = arith.constant dense<0.000000e+00> : vector<128x32xf32>
    %19 = tpu.matmul %17, %18, %cst_10 {dimension_numbers = #tpu.dot_dimension_numbers<[1], [0], [0], [1], [0, 0, 1, 1], [], []>} : vector<128x32xbf16>, vector<32x32xbf16>, vector<128x32xf32> -> vector<128x32xf32>
    %20 = vector.extract_strided_slice %0 {offsets = [2, 0], sizes = [1, 32], strides = [1, 1]} : vector<4x32xf32> to vector<1x32xf32>
    %21 = vector.broadcast %20 : vector<1x32xf32> to vector<128x32xf32>
    %22 = arith.addf %19, %21 : vector<128x32xf32>
    %cst_11 = arith.constant 0.000000e+00 : f32
    %23 = vector.broadcast %cst_11 : f32 to vector<128x32xf32>
    %24 = arith.maximumf %22, %23 : vector<128x32xf32>
    %25 = arith.truncf %24 : vector<128x32xf32> to vector<128x32xbf16>
    %c96 = arith.constant 96 : index
    %c0_12 = arith.constant 0 : index
    %26 = vector.load %arg3[%c96, %c0_12] : memref<128x32xbf16, #tpu.memory_space<vmem>>, vector<32x32xbf16>
    %cst_13 = arith.constant dense<0.000000e+00> : vector<128x32xf32>
    %27 = tpu.matmul %25, %26, %cst_13 {dimension_numbers = #tpu.dot_dimension_numbers<[1], [0], [0], [1], [0, 0, 1, 1], [], []>} : vector<128x32xbf16>, vector<32x32xbf16>, vector<128x32xf32> -> vector<128x32xf32>
    %28 = vector.extract_strided_slice %0 {offsets = [3, 0], sizes = [1, 32], strides = [1, 1]} : vector<4x32xf32> to vector<1x32xf32>
    %29 = vector.broadcast %28 : vector<1x32xf32> to vector<128x32xf32>
    %30 = arith.addf %27, %29 : vector<128x32xf32>
    %31 = vector.extract_strided_slice %30 {offsets = [0, 0], sizes = [128, 6], strides = [1, 1]} : vector<128x32xf32> to vector<128x6xf32>
    %32 = arith.mulf %31, %31 : vector<128x6xf32>
    %cst_14 = arith.constant dense<0.000000e+00> : vector<128xf32>
    %33 = vector.multi_reduction <add>, %32, %cst_14 [1] : vector<128x6xf32> to vector<128xf32>
    %34 = vector.shape_cast %33 : vector<128xf32> to vector<128x1xf32>
    %cst_15 = arith.constant 1.000000e-24 : f32
    %35 = vector.broadcast %cst_15 : f32 to vector<128x1xf32>
    %36 = arith.maximumf %34, %35 : vector<128x1xf32>
    %37 = math.rsqrt %36 : vector<128x1xf32>
    %38 = vector.broadcast %37 : vector<128x1xf32> to vector<128x6xf32>
    %39 = arith.mulf %31, %38 : vector<128x6xf32>
    %40 = arith.truncf %39 : vector<128x6xf32> to vector<128x6xbf16>
    %cst_16 = arith.constant dense<0.000000e+00> : vector<128x128xf32>
    %41 = tpu.matmul %40, %40, %cst_16 {dimension_numbers = #tpu.dot_dimension_numbers<[1], [1], [0], [0], [0, 0, 1, 0], [], []>} : vector<128x6xbf16>, vector<128x6xbf16>, vector<128x128xf32> -> vector<128x128xf32>
    %cst_17 = arith.constant 2.000000e+00 : f32
    %42 = vector.broadcast %cst_17 : f32 to vector<128x128xf32>
    %43 = arith.mulf %41, %42 : vector<128x128xf32>
    %c0_18 = arith.constant 0 : index
    %c0_19 = arith.constant 0 : index
    %44 = vector.load %arg1[%c0_18, %c0_19] : memref<128x128xbf16, #tpu.memory_space<vmem>>, vector<128x128xbf16>
    %cst_20 = arith.constant 0.000000e+00 : bf16
    %45 = vector.broadcast %cst_20 : bf16 to vector<128x128xbf16>
    %46 = arith.minimumf %44, %45 : vector<128x128xbf16>
    %cst_21 = arith.constant 1.000260e+30 : bf16
    %47 = vector.broadcast %cst_21 : bf16 to vector<128x128xbf16>
    %48 = arith.mulf %46, %47 : vector<128x128xbf16>
    %cst_22 = arith.constant 0.000000e+00 : bf16
    %49 = vector.broadcast %cst_22 : bf16 to vector<128x128xbf16>
    %50 = arith.maximumf %44, %49 : vector<128x128xbf16>
    %51 = arith.extf %48 : vector<128x128xbf16> to vector<128x128xf32>
    %52 = arith.addf %43, %51 : vector<128x128xf32>
    %cst_23 = arith.constant dense<0xFF800000> : vector<128xf32>
    %53 = vector.multi_reduction <maximumf>, %52, %cst_23 [1] : vector<128x128xf32> to vector<128xf32>
    %54 = vector.shape_cast %53 : vector<128xf32> to vector<128x1xf32>
    %55 = vector.broadcast %54 : vector<128x1xf32> to vector<128x128xf32>
    %56 = arith.subf %43, %55 : vector<128x128xf32>
    %57 = math.exp %56 : vector<128x128xf32>
    %58 = arith.extf %50 : vector<128x128xbf16> to vector<128x128xf32>
    %59 = arith.mulf %57, %58 : vector<128x128xf32>
    %cst_24 = arith.constant 1.000000e+00 : f32
    %60 = vector.broadcast %cst_24 : f32 to vector<128x1xf32>
    %cst_25 = arith.constant dense<0.000000e+00> : vector<128x1xf32>
    %61 = tpu.matmul %59, %60, %cst_25 {dimension_numbers = #tpu.dot_dimension_numbers<[1], [0], [0], [1], [0, 0, 1, 1], [], []>} : vector<128x128xf32>, vector<128x1xf32>, vector<128x1xf32> -> vector<128x1xf32>
    %c0_26 = arith.constant 0 : index
    %c0_27 = arith.constant 0 : index
    %62 = vector.load %arg2[%c0_26, %c0_27] : memref<128x1xf32, #tpu.memory_space<vmem>>, vector<128x1xf32>
    %cst_28 = arith.constant 0.000000e+00 : f32
    %63 = vector.broadcast %cst_28 : f32 to vector<1x1xf32>
    %64 = vector.extract_strided_slice %39 {offsets = [0, 0], sizes = [64, 6], strides = [1, 1]} : vector<128x6xf32> to vector<64x6xf32>
    %65 = vector.extract_strided_slice %39 {offsets = [49, 0], sizes = [1, 6], strides = [1, 1]} : vector<128x6xf32> to vector<1x6xf32>
    %66 = vector.broadcast %65 : vector<1x6xf32> to vector<64x6xf32>
    %67 = arith.mulf %64, %66 : vector<64x6xf32>
    %68 = math.exp %67 : vector<64x6xf32>
    %cst_29 = arith.constant dense<0.000000e+00> : vector<64xf32>
    %69 = vector.multi_reduction <add>, %68, %cst_29 [1] : vector<64x6xf32> to vector<64xf32>
    %70 = vector.shape_cast %69 : vector<64xf32> to vector<64x1xf32>
    %71 = vector.extract_strided_slice %61 {offsets = [0, 0], sizes = [64, 1], strides = [1, 1]} : vector<128x1xf32> to vector<64x1xf32>
    %72 = vector.extract_strided_slice %62 {offsets = [0, 0], sizes = [64, 1], strides = [1, 1]} : vector<128x1xf32> to vector<64x1xf32>
    %cst_30 = arith.constant 9.99999997E-7 : f32
    %73 = vector.broadcast %cst_30 : f32 to vector<64x1xf32>
    %74 = arith.addf %71, %73 : vector<64x1xf32>
    %75 = tpu.reciprocal %74 {approx = true} : vector<64x1xf32> -> vector<64x1xf32>
    %76 = arith.mulf %70, %75 : vector<64x1xf32>
    %cst_31 = arith.constant 9.99999997E-7 : f32
    %77 = vector.broadcast %cst_31 : f32 to vector<64x1xf32>
    %78 = arith.addf %76, %77 : vector<64x1xf32>
    %79 = math.log %78 : vector<64x1xf32>
    %cst_32 = arith.constant 0.000000e+00 : f32
    %80 = vector.broadcast %cst_32 : f32 to vector<64x1xf32>
    %81 = arith.subf %80, %79 : vector<64x1xf32>
    %82 = arith.mulf %81, %72 : vector<64x1xf32>
    %cst_33 = arith.constant dense<0.000000e+00> : vector<1xf32>
    %83 = vector.multi_reduction <add>, %82, %cst_33 [0] : vector<64x1xf32> to vector<1xf32>
    %84 = vector.shape_cast %83 : vector<1xf32> to vector<1x1xf32>
    %85 = arith.addf %63, %84 : vector<1x1xf32>
    %86 = vector.extract_strided_slice %39 {offsets = [64, 0], sizes = [64, 6], strides = [1, 1]} : vector<128x6xf32> to vector<64x6xf32>
    %87 = vector.extract_strided_slice %39 {offsets = [113, 0], sizes = [1, 6], strides = [1, 1]} : vector<128x6xf32> to vector<1x6xf32>
    %88 = vector.broadcast %87 : vector<1x6xf32> to vector<64x6xf32>
    %89 = arith.mulf %86, %88 : vector<64x6xf32>
    %90 = math.exp %89 : vector<64x6xf32>
    %cst_34 = arith.constant dense<0.000000e+00> : vector<64xf32>
    %91 = vector.multi_reduction <add>, %90, %cst_34 [1] : vector<64x6xf32> to vector<64xf32>
    %92 = vector.shape_cast %91 : vector<64xf32> to vector<64x1xf32>
    %93 = vector.extract_strided_slice %61 {offsets = [64, 0], sizes = [64, 1], strides = [1, 1]} : vector<128x1xf32> to vector<64x1xf32>
    %94 = vector.extract_strided_slice %62 {offsets = [64, 0], sizes = [64, 1], strides = [1, 1]} : vector<128x1xf32> to vector<64x1xf32>
    %cst_35 = arith.constant 9.99999997E-7 : f32
    %95 = vector.broadcast %cst_35 : f32 to vector<64x1xf32>
    %96 = arith.addf %93, %95 : vector<64x1xf32>
    %97 = tpu.reciprocal %96 {approx = true} : vector<64x1xf32> -> vector<64x1xf32>
    %98 = arith.mulf %92, %97 : vector<64x1xf32>
    %cst_36 = arith.constant 9.99999997E-7 : f32
    %99 = vector.broadcast %cst_36 : f32 to vector<64x1xf32>
    %100 = arith.addf %98, %99 : vector<64x1xf32>
    %101 = math.log %100 : vector<64x1xf32>
    %cst_37 = arith.constant 0.000000e+00 : f32
    %102 = vector.broadcast %cst_37 : f32 to vector<64x1xf32>
    %103 = arith.subf %102, %101 : vector<64x1xf32>
    %104 = arith.mulf %103, %94 : vector<64x1xf32>
    %cst_38 = arith.constant dense<0.000000e+00> : vector<1xf32>
    %105 = vector.multi_reduction <add>, %104, %cst_38 [0] : vector<64x1xf32> to vector<1xf32>
    %106 = vector.shape_cast %105 : vector<1xf32> to vector<1x1xf32>
    %107 = arith.addf %85, %106 : vector<1x1xf32>
    %c0_39 = arith.constant 0 : index
    %c0_40 = arith.constant 0 : index
    %108 = vector.load %arg5[%c0_39, %c0_40] : memref<1x1xf32, #tpu.memory_space<vmem>>, vector<1x1xf32>
    tpu.vector_store %arg5[%c0_39, %c0_40], %107 {strides = array<i32>} : memref<1x1xf32, #tpu.memory_space<vmem>>, vector<1x1xf32>,
    return
  }
}

</mosaic_0001>

<bundles_post_ra>
// kernel: loss_fn.1
= control target key start
LH: loop header
LB: loop body
LE: loop exit
PB: predicated region body
PF: predicated region fallthrough
CT: control target
= control target key end

     0   :  { %vm100_vm0 = vcmask 261120   ;;  %s2809_s0 = inlined_call_operand.vmem [shape: bf16[128,32], index: 0, kind: input, shape index: {}]   ;;  %s2810_s1 = inlined_call_operand.vmem [shape: bf16[128,128], index: 1, kind: input, shape index: {}]   ;;  %s2811_s2 = inlined_call_operand.vmem [shape: f32[128,1], index: 2, kind: input, shape index: {}]   ;;  %s2812_s3 = inlined_call_operand.vmem [shape: bf16[128,32], index: 3, kind: input, shape index: {}]   ;;  %s2813_s4 = inlined_call_operand.vmem [shape: f32[4,32], index: 4, kind: input, shape index: {}]   ;;  %s2814_s5 = inlined_call_operand.hbm [shape: f32[1,1], index: 5, kind: output, shape index: {}]  }
   0x1   :  { %v1964_v0 = vld [vmem:[%s2812_s3 + $0x8] sm:$0xff]   ;;  %v1965_v1 = vld [vmem:[%s2812_s3] sm:$0xff]   ;;  %v1968_v4 = vld [vmem:[%s2809_s0 + $0x10] sm:$0xff]  }
   0x2   :  { %1781 = vmatprep.subr.bf16.mxu0 %v1964_v0  ;;  %v1966_v2 = vld [vmem:[%s2809_s0] sm:$0xff]   ;;  %1949 = vmatprep.subr.bf16.mxu1 %v1964_v0  ;;  %v1967_v3 = vld [vmem:[%s2809_s0 + $0x8] sm:$0xff]   ;;  %v1972_v7 = vld [vmem:[%s2809_s0 + $0x30] sm:$0xff]  }
   0x3   :  { %1782 = vmatpush3.bf16.msra.mxu0 %v1964_v0  ;;  %1951 = vmatpush3.bf16.msra.mxu1 %v1964_v0  ;;  %v1970_v5 = vld [vmem:[%s2809_s0 + $0x20] sm:$0xff]   ;;  %v1971_v6 = vld [vmem:[%s2809_s0 + $0x28] sm:$0xff]   ;;  %v1974_v8 = vld [vmem:[%s2812_s3 + $0x18] sm:$0xff]  }
   0x4   :  { %1783 = vmatprep.subr.bf16.mxu0 %v1965_v1  ;;  %1785 = vmatprep.mubr.msk.bf16.mxu0 %vm100_vm0, %v1966_v2  ;;  %v1969_v9 = vld [vmem:[%s2809_s0 + $0x18] sm:$0xff]  }
   0x5   :  { %1950 = vmatprep.subr.bf16.mxu1 %v1965_v1  ;;  %1793 = vmatprep.mubr.msk.bf16.mxu1 %vm100_vm0, %v1970_v5  ;;  %v1973_v10 = vld [vmem:[%s2809_s0 + $0x38] sm:$0xff]  }
   0x7   :  { %1784 = vmatpush3.bf16.msra.mxu0 %v1965_v1  ;;  %1952 = vmatpush3.bf16.msra.mxu1 %v1965_v1 }
   0x8   :  { %1801 = vmatprep.subr.bf16.mxu1 %v1974_v8 }
   0xa   :  { %1786 = vmatmul.mubr.msk.bf16.vlgmr.msra.gmra.mxu0 %vm100_vm0, %v1967_v3  ;;  %1794 = vmatmul.mubr.msk.bf16.vlgmr.msra.gmra.mxu1 %vm100_vm0, %v1971_v6 }
   0xb   :  { %1789 = vmatprep.mubr.msk.bf16.mxu0 %vm100_vm0, %v1968_v4  ;;  %1797 = vmatprep.mubr.msk.bf16.mxu1 %vm100_vm0, %v1972_v7 }
   0xc   :  { %1802 = vmatpush3.bf16.msra.mxu1 %v1974_v8 }
   0xd   :  { %10 = vsyncpa [#allocation3], 0  ;;  %v1975_v11 = vld [vmem:[%s2812_s3 + $0x10] sm:$0xff]   ;;  %v1976_v12 = vld [vmem:[%s2812_s3 + $0x28] sm:$0xff]   ;;  %v44_v13 = vlaneseq  ;;  %vm733_vm1 = vcmask 48128   ;;  %vm1460_vm2 = vcmask 7168  }
   0xe   :  { %1803 = vmatprep.subr.bf16.mxu1 %v1975_v11  ;;  %1821 = vmatprep.subr.bf16.mxu0 %v1976_v12  ;;  %v2248_v16 = vld [vmem:[%s2813_s4] sm:$0xf]  ;;  %vm1621_vm3 = vcmask 0  }
   0xf   :  { %1822 = vmatpush3.bf16.msra.mxu0 %v1976_v12  ;;  %v2242_v14 = vshrl.u32 %v44_v13, 7  ;;  %v1979_v12 = vld [vmem:[%s2812_s3 + $0x30] sm:$0xff]  }
  0x10   :  { %1804 = vmatpush3.bf16.msra.mxu1 %v1975_v11  ;;  %v1978_v11 = vld [vmem:[%s2812_s3 + $0x38] sm:$0xff]  }
  0x11   :  { %v46_v15 = vsub.s32 0, %v2242_v14  ;;  %1841 = vmatprep.subr.bf16.mxu1 %v1978_v11  ;;  %v2269_v13 = vsub.s32 1, %v2242_v14 }
  0x12   :  { %1790 = vmatmul.mubr.msk.bf16.gmra.mxu0 %vm100_vm0, %v1969_v9  ;;  %1798 = vmatmul.mubr.msk.bf16.gmra.mxu1 %vm100_vm0, %v1973_v10  ;;  %v1977_v10 = vld [vmem:[%s2812_s3 + $0x20] sm:$0xff]  }
  0x13   :  { %v47_v19 = vrot.slane %v2248_v16, %v46_v15  ;;  %1823 = vmatprep.subr.bf16.mxu0 %v1977_v10 }
  0x14   :  { %1824 = vmatpush3.bf16.msra.mxu0 %v1977_v10 }
  0xca   :  { %v1787_v17 = vpop.f32.mrf.mxu0  ;;  %v1795_v18 = vpop.f32.mrf.mxu1 }
  0xcb   :  { %v168_v26 = vadd.f32 %v1787_v17, %v47_v19  ;;  %v200_v60 = vadd.f32 %v1795_v18, %v47_v19  ;;  %v253_v17 = vrot.slane %v2248_v16, %v2269_v13 }
  0xcc   :  { %v159_v20 = vpop.f32.mrf.mxu0  ;;  %v191_v21 = vpop.f32.mrf.mxu1 }
  0xcd   :  { %v160_v24 = vadd.f32 %v159_v20, %v47_v19  ;;  %v224_v35 = vmax.f32 %v168_v26, 0.0  ;;  %v192_v39 = vadd.f32 %v191_v21, %v47_v19  ;;  %v232_v1 = vmax.f32 %v200_v60, 0.0 }
  0xce   :  { %v1788_v22 = vpop.f32.mrf.mxu0  ;;  %v1796_v23 = vpop.f32.mrf.mxu1 }
  0xcf   :  { %v171_v25 = vadd.f32 %v1788_v22, %v47_v19  ;;  %v222_v33 = vmax.f32 %v160_v24, 0.0  ;;  %v230_v48 = vmax.f32 %v192_v39, 0.0  ;;  %v203_v62 = vadd.f32 %v1796_v23, %v47_v19 }
  0xd0   :  { %v162_v27 = vpop.f32.mrf.mxu0  ;;  %v194_v28 = vpop.f32.mrf.mxu1 }
  0xd1   :  { %v163_v29 = vadd.f32 %v162_v27, %v47_v19  ;;  %v225_v30 = vmax.f32 %v171_v25, 0.0  ;;  %v195_v40 = vadd.f32 %v194_v28, %v47_v19  ;;  %v233_v2 = vmax.f32 %v203_v62, 0.0 }
  0xd2   :  { %v1791_v31 = vpop.f32.mrf.mxu0  ;;  %v1799_v32 = vpop.f32.mrf.mxu1 }
  0xd3   :  { %v223_v34 = vmax.f32 %v163_v29, 0.0  ;;  %v239_v41 = vpack.c.bf16 %v225_v30, %v224_v35  ;;  %v184_v46 = vadd.f32 %v1791_v31, %v47_v19  ;;  %v231_v50 = vmax.f32 %v195_v40, 0.0 }
  0xd4   :  { %v175_v36 = vpop.f32.mrf.mxu0  ;;  %v207_v37 = vpop.f32.mrf.mxu1  ;;  %v243_v4 = vpack.c.bf16 %v233_v2, %v232_v1  ;;  %v216_v5 = vadd.f32 %v1799_v32, %v47_v19 }
  0xd5   :  { %v238_v38 = vpack.c.bf16 %v223_v34, %v222_v33  ;;  %v176_v44 = vadd.f32 %v175_v36, %v47_v19  ;;  %v228_v55 = vmax.f32 %v184_v46, 0.0  ;;  %v242_v57 = vpack.c.bf16 %v231_v50, %v230_v48 }
  0xd6   :  { %v1792_v42 = vpop.f32.mrf.mxu0  ;;  %v1800_v43 = vpop.f32.mrf.mxu1  ;;  %v208_v58 = vadd.f32 %v207_v37, %v47_v19  ;;  %v236_v7 = vmax.f32 %v216_v5, 0.0 }
  0xd7   :  { %v187_v45 = vadd.f32 %v1792_v42, %v47_v19  ;;  %1805 = vmatprep.mubr.msk.bf16.mxu1 %vm100_vm0, %v238_v38  ;;  %v226_v53 = vmax.f32 %v176_v44, 0.0  ;;  %v219_v6 = vadd.f32 %v1800_v43, %v47_v19 }
  0xd8   :  { %v178_v47 = vpop.f32.mrf.mxu0  ;;  %1806 = vmatmul.mubr.msk.bf16.vlgmr.msra.gmra.mxu1 %vm100_vm0, %v239_v41  ;;  %v210_v52 = vpop.f32.mrf.mxu1  ;;  %v234_v63 = vmax.f32 %v208_v58, 0.0 }
  0xd9   :  { %v179_v49 = vadd.f32 %v178_v47, %v47_v19  ;;  %v229_v51 = vmax.f32 %v187_v45, 0.0  ;;  %v211_v59 = vadd.f32 %v210_v52, %v47_v19  ;;  %v237_v8 = vmax.f32 %v219_v6, 0.0  ;;  %1842 = vmatpush3.bf16.msra.mxu1 %v1978_v11 }
  0xda   :  { %1843 = vmatprep.subr.bf16.mxu1 %v1979_v12 }
  0xdb   :  { %v227_v54 = vmax.f32 %v179_v49, 0.0  ;;  %v241_v61 = vpack.c.bf16 %v229_v51, %v228_v55  ;;  %v235_v0 = vmax.f32 %v211_v59, 0.0  ;;  %v245_v9 = vpack.c.bf16 %v237_v8, %v236_v7 }
  0xdd   :  { %v240_v56 = vpack.c.bf16 %v227_v54, %v226_v53  ;;  %v244_v3 = vpack.c.bf16 %v235_v0, %v234_v63  ;;  %1844 = vmatpush3.bf16.msra.mxu1 %v1979_v12 }
  0xdf   :  { %1809 = vmatprep.mubr.msk.bf16.mxu1 %vm100_vm0, %v240_v56 }
  0xe0   :  { %1810 = vmatmul.mubr.msk.bf16.gmra.mxu1 %vm100_vm0, %v241_v61 }
  0xe1   :  { %1813 = vmatprep.mubr.msk.bf16.mxu1 %vm100_vm0, %v242_v57 }
  0xe8   :  { %1814 = vmatmul.mubr.msk.bf16.gmra.mxu1 %vm100_vm0, %v243_v4 }
  0xe9   :  { %1817 = vmatprep.mubr.msk.bf16.mxu1 %vm100_vm0, %v244_v3 }
  0xf0   :  { %1818 = vmatmul.mubr.msk.bf16.gmra.mxu1 %vm100_vm0, %v245_v9  ;;  %v417_v9 = vsub.s32 2, %v2242_v14 }
  0xf2   :  { %v418_v11 = vrot.slane %v2248_v16, %v417_v9 }
 0x198   :  { %v1807_v15 = vpop.f32.mrf.mxu1 }
 0x199   :  { %v333_v22 = vadd.f32 %v1807_v15, %v253_v17 }
 0x19a   :  { %v324_v18 = vpop.f32.mrf.mxu1 }
 0x19b   :  { %v325_v20 = vadd.f32 %v324_v18, %v253_v17  ;;  %v389_v29 = vmax.f32 %v333_v22, 0.0 }
 0x19c   :  { %v1808_v19 = vpop.f32.mrf.mxu1 }
 0x19d   :  { %v336_v21 = vadd.f32 %v1808_v19, %v253_v17  ;;  %v387_v27 = vmax.f32 %v325_v20, 0.0 }
 0x19e   :  { %v327_v23 = vpop.f32.mrf.mxu1 }
 0x19f   :  { %v328_v24 = vadd.f32 %v327_v23, %v253_v17  ;;  %v390_v25 = vmax.f32 %v336_v21, 0.0 }
 0x1a0   :  { %v1811_v26 = vpop.f32.mrf.mxu1 }
 0x1a1   :  { %v388_v28 = vmax.f32 %v328_v24, 0.0  ;;  %v404_v32 = vpack.c.bf16 %v390_v25, %v389_v29  ;;  %v349_v36 = vadd.f32 %v1811_v26, %v253_v17 }
 0x1a2   :  { %v340_v30 = vpop.f32.mrf.mxu1 }
 0x1a3   :  { %v403_v31 = vpack.c.bf16 %v388_v28, %v387_v27  ;;  %v341_v34 = vadd.f32 %v340_v30, %v253_v17  ;;  %v393_v43 = vmax.f32 %v349_v36, 0.0 }
 0x1a4   :  { %v1812_v33 = vpop.f32.mrf.mxu1 }
 0x1a5   :  { %v352_v35 = vadd.f32 %v1812_v33, %v253_v17  ;;  %1825 = vmatprep.mubr.msk.bf16.mxu0 %vm100_vm0, %v403_v31  ;;  %v391_v41 = vmax.f32 %v341_v34, 0.0 }
 0x1a6   :  { %v343_v37 = vpop.f32.mrf.mxu1  ;;  %1826 = vmatmul.mubr.msk.bf16.vlgmr.msra.gmra.mxu0 %vm100_vm0, %v404_v32 }
 0x1a7   :  { %v344_v38 = vadd.f32 %v343_v37, %v253_v17  ;;  %v394_v39 = vmax.f32 %v352_v35, 0.0 }
 0x1a8   :  { %v1815_v40 = vpop.f32.mrf.mxu1 }
 0x1a9   :  { %v392_v42 = vmax.f32 %v344_v38, 0.0  ;;  %v406_v46 = vpack.c.bf16 %v394_v39, %v393_v43  ;;  %v365_v50 = vadd.f32 %v1815_v40, %v253_v17 }
 0x1aa   :  { %v356_v44 = vpop.f32.mrf.mxu1 }
 0x1ab   :  { %v405_v45 = vpack.c.bf16 %v392_v42, %v391_v41  ;;  %v357_v48 = vadd.f32 %v356_v44, %v253_v17  ;;  %v397_v57 = vmax.f32 %v365_v50, 0.0 }
 0x1ac   :  { %v1816_v47 = vpop.f32.mrf.mxu1 }
 0x1ad   :  { %v368_v49 = vadd.f32 %v1816_v47, %v253_v17  ;;  %1829 = vmatprep.mubr.msk.bf16.mxu0 %vm100_vm0, %v405_v45  ;;  %v395_v55 = vmax.f32 %v357_v48, 0.0 }
 0x1ae   :  { %v359_v51 = vpop.f32.mrf.mxu1  ;;  %1830 = vmatmul.mubr.msk.bf16.gmra.mxu0 %vm100_vm0, %v406_v46 }
 0x1af   :  { %v360_v52 = vadd.f32 %v359_v51, %v253_v17  ;;  %v398_v53 = vmax.f32 %v368_v49, 0.0 }
 0x1b0   :  { %v1819_v54 = vpop.f32.mrf.mxu1 }
 0x1b1   :  { %v396_v56 = vmax.f32 %v360_v52, 0.0  ;;  %v408_v60 = vpack.c.bf16 %v398_v53, %v397_v57  ;;  %v381_v0 = vadd.f32 %v1819_v54, %v253_v17 }
 0x1b2   :  { %v372_v58 = vpop.f32.mrf.mxu1 }
 0x1b3   :  { %v407_v59 = vpack.c.bf16 %v396_v56, %v395_v55  ;;  %v373_v62 = vadd.f32 %v372_v58, %v253_v17  ;;  %v401_v6 = vmax.f32 %v381_v0, 0.0 }
 0x1b4   :  { %v1820_v61 = vpop.f32.mrf.mxu1 }
 0x1b5   :  { %v384_v63 = vadd.f32 %v1820_v61, %v253_v17  ;;  %1833 = vmatprep.mubr.msk.bf16.mxu0 %vm100_vm0, %v407_v59  ;;  %v399_v4 = vmax.f32 %v373_v62, 0.0 }
 0x1b6   :  { %v375_v1 = vpop.f32.mrf.mxu1  ;;  %1834 = vmatmul.mubr.msk.bf16.gmra.mxu0 %vm100_vm0, %v408_v60 }
 0x1b7   :  { %v376_v2 = vadd.f32 %v375_v1, %v253_v17  ;;  %v402_v3 = vmax.f32 %v384_v63, 0.0 }
 0x1b9   :  { %v400_v5 = vmax.f32 %v376_v2, 0.0  ;;  %v410_v8 = vpack.c.bf16 %v402_v3, %v401_v6 }
 0x1bb   :  { %v409_v7 = vpack.c.bf16 %v400_v5, %v399_v4 }
 0x1bd   :  { %1837 = vmatprep.mubr.msk.bf16.mxu0 %vm100_vm0, %v409_v7 }
 0x1be   :  { %1838 = vmatmul.mubr.msk.bf16.gmra.mxu0 %vm100_vm0, %v410_v8 }
 0x266   :  { %v1827_v10 = vpop.f32.mrf.mxu0 }
 0x267   :  { %v498_v17 = vadd.f32 %v1827_v10, %v418_v11 }
 0x268   :  { %v489_v12 = vpop.f32.mrf.mxu0 }
 0x269   :  { %v490_v18 = vadd.f32 %v489_v12, %v418_v11  ;;  %v554_v26 = vmax.f32 %v498_v17, 0.0  ;;  %v582_v17 = vsub.s32 3, %v2242_v14 }
 0x26a   :  { %v1828_v15 = vpop.f32.mrf.mxu0 }
 0x26b   :  { %v501_v19 = vadd.f32 %v1828_v15, %v418_v11  ;;  %v552_v24 = vmax.f32 %v490_v18, 0.0 }
 0x26c   :  { %v492_v20 = vpop.f32.mrf.mxu0 }
 0x26d   :  { %v493_v21 = vadd.f32 %v492_v20, %v418_v11  ;;  %v555_v22 = vmax.f32 %v501_v19, 0.0 }
 0x26e   :  { %v1831_v23 = vpop.f32.mrf.mxu0 }
 0x26f   :  { %v553_v25 = vmax.f32 %v493_v21, 0.0  ;;  %v569_v29 = vpack.c.bf16 %v555_v22, %v554_v26  ;;  %v514_v33 = vadd.f32 %v1831_v23, %v418_v11  ;;  %v583_v22 = vrot.slane %v2248_v16, %v582_v17 }
 0x270   :  { %v505_v27 = vpop.f32.mrf.mxu0 }
 0x271   :  { %v568_v28 = vpack.c.bf16 %v553_v25, %v552_v24  ;;  %v506_v31 = vadd.f32 %v505_v27, %v418_v11  ;;  %v558_v40 = vmax.f32 %v514_v33, 0.0 }
 0x272   :  { %v1832_v30 = vpop.f32.mrf.mxu0 }
 0x273   :  { %v517_v32 = vadd.f32 %v1832_v30, %v418_v11  ;;  %1845 = vmatprep.mubr.msk.bf16.mxu1 %vm100_vm0, %v568_v28  ;;  %v556_v38 = vmax.f32 %v506_v31, 0.0 }
 0x274   :  { %v508_v34 = vpop.f32.mrf.mxu0  ;;  %1846 = vmatmul.mubr.msk.bf16.vlgmr.msra.gmra.mxu1 %vm100_vm0, %v569_v29 }
 0x275   :  { %v509_v35 = vadd.f32 %v508_v34, %v418_v11  ;;  %v559_v36 = vmax.f32 %v517_v32, 0.0 }
 0x276   :  { %v1835_v37 = vpop.f32.mrf.mxu0 }
 0x277   :  { %v557_v39 = vmax.f32 %v509_v35, 0.0  ;;  %v571_v43 = vpack.c.bf16 %v559_v36, %v558_v40  ;;  %v530_v47 = vadd.f32 %v1835_v37, %v418_v11 }
 0x278   :  { %v521_v41 = vpop.f32.mrf.mxu0 }
 0x279   :  { %v570_v42 = vpack.c.bf16 %v557_v39, %v556_v38  ;;  %v522_v45 = vadd.f32 %v521_v41, %v418_v11  ;;  %v562_v54 = vmax.f32 %v530_v47, 0.0 }
 0x27a   :  { %v1836_v44 = vpop.f32.mrf.mxu0 }
 0x27b   :  { %v533_v46 = vadd.f32 %v1836_v44, %v418_v11  ;;  %1849 = vmatprep.mubr.msk.bf16.mxu1 %vm100_vm0, %v570_v42  ;;  %v560_v52 = vmax.f32 %v522_v45, 0.0 }
 0x27c   :  { %v524_v48 = vpop.f32.mrf.mxu0  ;;  %1850 = vmatmul.mubr.msk.bf16.gmra.mxu1 %vm100_vm0, %v571_v43 }
 0x27d   :  { %v525_v49 = vadd.f32 %v524_v48, %v418_v11  ;;  %v563_v50 = vmax.f32 %v533_v46, 0.0 }
 0x27e   :  { %v1839_v51 = vpop.f32.mrf.mxu0 }
 0x27f   :  { %v561_v53 = vmax.f32 %v525_v49, 0.0  ;;  %v573_v57 = vpack.c.bf16 %v563_v50, %v562_v54  ;;  %v546_v61 = vadd.f32 %v1839_v51, %v418_v11 }
 0x280   :  { %v537_v55 = vpop.f32.mrf.mxu0 }
 0x281   :  { %v572_v56 = vpack.c.bf16 %v561_v53, %v560_v52  ;;  %v538_v59 = vadd.f32 %v537_v55, %v418_v11  ;;  %v566_v3 = vmax.f32 %v546_v61, 0.0 }
 0x282   :  { %v1840_v58 = vpop.f32.mrf.mxu0 }
 0x283   :  { %v549_v60 = vadd.f32 %v1840_v58, %v418_v11  ;;  %1853 = vmatprep.mubr.msk.bf16.mxu1 %vm100_vm0, %v572_v56  ;;  %v564_v1 = vmax.f32 %v538_v59, 0.0 }
 0x284   :  { %v540_v62 = vpop.f32.mrf.mxu0  ;;  %1854 = vmatmul.mubr.msk.bf16.gmra.mxu1 %vm100_vm0, %v573_v57 }
 0x285   :  { %v541_v63 = vadd.f32 %v540_v62, %v418_v11  ;;  %v567_v0 = vmax.f32 %v549_v60, 0.0 }
 0x287   :  { %v565_v2 = vmax.f32 %v541_v63, 0.0  ;;  %v575_v5 = vpack.c.bf16 %v567_v0, %v566_v3 }
 0x289   :  { %v574_v4 = vpack.c.bf16 %v565_v2, %v564_v1 }
 0x28b   :  { %1857 = vmatprep.mubr.msk.bf16.mxu1 %vm100_vm0, %v574_v4 }
 0x28c   :  { %1858 = vmatmul.mubr.msk.bf16.gmra.mxu1 %vm100_vm0, %v575_v5 }
 0x334   :  { %v1847_v6 = vpop.f32.mrf.mxu1 }
 0x335   :  { %v2349_v55 = vadd.f32 %v1847_v6, %v583_v22 }
 0x336   :  { %v2291_v7 = vpop.f32.mrf.mxu1 }
 0x337   :  { %v2360_v61 = vadd.f32 %v2291_v7, %v583_v22  ;;  %v719_v63 = vmul.f32 %v2349_v55, %v2349_v55 }
 0x338   :  { %v1848_v8 = vpop.f32.mrf.mxu1 }
 0x339   :  { %v2354_v58 = vadd.f32 %v1848_v8, %v583_v22  ;;  %v740_v3 = vsel %vm733_vm1, %v719_v63, 0.0  ;;  %v717_v4 = vmul.f32 %v2360_v61, %v2360_v61 }
 0x33a   :  { %v2293_v9 = vpop.f32.mrf.mxu1 }
 0x33b   :  { %v2366_v0 = vadd.f32 %v2293_v9, %v583_v22  ;;  %v720_v2 = vmul.f32 %v2354_v58, %v2354_v58  ;;  %v734_v7 = vsel %vm733_vm1, %v717_v4, 0.0 }
 0x33c   :  { %v1851_v10 = vpop.f32.mrf.mxu1 }
 0x33d   :  { %v2329_v43 = vadd.f32 %v1851_v10, %v583_v22  ;;  %v743_v5 = vsel %vm733_vm1, %v720_v2, 0.0  ;;  %v718_v6 = vmul.f32 %v2366_v0, %v2366_v0 }
 0x33e   :  { %v670_v12 = vpop.f32.mrf.mxu1 }
 0x33f   :  { %v2339_v49 = vadd.f32 %v670_v12, %v583_v22  ;;  %v723_v51 = vmul.f32 %v2329_v43, %v2329_v43  ;;  %v737_v8 = vsel %vm733_vm1, %v718_v6, 0.0 }
 0x340   :  { %v1852_v15 = vpop.f32.mrf.mxu1 }
 0x341   :  { %v2334_v46 = vadd.f32 %v1852_v15, %v583_v22  ;;  %v752_v56 = vsel %vm733_vm1, %v723_v51, 0.0  ;;  %v721_v57 = vmul.f32 %v2339_v49, %v2339_v49 }
 0x342   :  { %v673_v11 = vpop.f32.mrf.mxu1 }
 0x343   :  { %v2344_v52 = vadd.f32 %v673_v11, %v583_v22  ;;  %v724_v54 = vmul.f32 %v2334_v46, %v2334_v46  ;;  %v746_v62 = vsel %vm733_vm1, %v721_v57, 0.0 }
 0x344   :  { %v1855_v18 = vpop.f32.mrf.mxu1 }
 0x345   :  { %v2303_v29 = vadd.f32 %v1855_v18, %v583_v22  ;;  %v755_v59 = vsel %vm733_vm1, %v724_v54, 0.0  ;;  %v722_v60 = vmul.f32 %v2344_v52, %v2344_v52 }
 0x346   :  { %v686_v19 = vpop.f32.mrf.mxu1 }
 0x347   :  { %v2317_v36 = vadd.f32 %v686_v19, %v583_v22  ;;  %v727_v39 = vmul.f32 %v2303_v29, %v2303_v29  ;;  %v749_v1 = vsel %vm733_vm1, %v722_v60, 0.0 }
 0x348   :  { %v1856_v20 = vpop.f32.mrf.mxu1 }
 0x349   :  { %v2310_v32 = vadd.f32 %v1856_v20, %v583_v22  ;;  %v764_v44 = vsel %vm733_vm1, %v727_v39, 0.0  ;;  %v725_v45 = vmul.f32 %v2317_v36, %v2317_v36 }
 0x34a   :  { %v689_v21 = vpop.f32.mrf.mxu1 }
 0x34b   :  { %v2324_v40 = vadd.f32 %v689_v21, %v583_v22  ;;  %v728_v42 = vmul.f32 %v2310_v32, %v2310_v32  ;;  %v758_v50 = vsel %vm733_vm1, %v725_v45, 0.0 }
 0x34c   :  { %v1859_v23 = vpop.f32.mrf.mxu1 }
 0x34d   :  { %v2297_v24 = vadd.f32 %v1859_v23, %v583_v22  ;;  %v767_v47 = vsel %vm733_vm1, %v728_v42, 0.0  ;;  %v726_v48 = vmul.f32 %v2324_v40, %v2324_v40 }
 0x34e   :  { %v702_v25 = vpop.f32.mrf.mxu1 }
 0x34f   :  { %v2299_v26 = vadd.f32 %v702_v25, %v583_v22  ;;  %v731_v27 = vmul.f32 %v2297_v24, %v2297_v24  ;;  %v761_v53 = vsel %vm733_vm1, %v726_v48, 0.0 }
 0x350   :  { %v1860_v28 = vpop.f32.mrf.mxu1 }
 0x351   :  { %v2305_v30 = vadd.f32 %v1860_v28, %v583_v22  ;;  %v776_v14 = vsel %vm733_vm1, %v731_v27, 0.0  ;;  %v729_v16 = vmul.f32 %v2299_v26, %v2299_v26 }
 0x352   :  { %777 = vadd.xlane.f32.xlu0 %v776_v14  ;;  %v705_v31 = vpop.f32.mrf.mxu1 }
 0x353   :  { %v2312_v33 = vadd.f32 %v705_v31, %v583_v22  ;;  %v770_v34 = vsel %vm733_vm1, %v729_v16, 0.0  ;;  %v732_v35 = vmul.f32 %v2305_v30, %v2305_v30 }
 0x354   :  { %771 = vadd.xlane.f32.xlu1 %v770_v34 }
 0x355   :  { %v779_v37 = vsel %vm733_vm1, %v732_v35, 0.0  ;;  %v730_v38 = vmul.f32 %v2312_v33, %v2312_v33 }
 0x356   :  { %780 = vadd.xlane.f32.xlu0 %v779_v37 }
 0x357   :  { %v773_v41 = vsel %vm733_vm1, %v730_v38, 0.0 }
 0x358   :  { %774 = vadd.xlane.f32.xlu1 %v773_v41 }
 0x35a   :  { %765 = vadd.xlane.f32.xlu0 %v764_v44 }
 0x35c   :  { %768 = vadd.xlane.f32.xlu1 %v767_v47 }
 0x35e   :  { %759 = vadd.xlane.f32.xlu0 %v758_v50 }
 0x360   :  { %762 = vadd.xlane.f32.xlu1 %v761_v53 }
 0x362   :  { %753 = vadd.xlane.f32.xlu0 %v752_v56 }
 0x364   :  { %756 = vadd.xlane.f32.xlu1 %v755_v59 }
 0x366   :  { %747 = vadd.xlane.f32.xlu0 %v746_v62 }
 0x368   :  { %750 = vadd.xlane.f32.xlu1 %v749_v1 }
 0x36a   :  { %741 = vadd.xlane.f32.xlu0 %v740_v3 }
 0x36c   :  { %744 = vadd.xlane.f32.xlu1 %v743_v5 }
 0x36e   :  { %735 = vadd.xlane.f32.xlu0 %v734_v7 }
 0x370   :  { %738 = vadd.xlane.f32.xlu1 %v737_v8 }
 0x3db   :  { %v778_v9 = vpop.xlane.xlu0 %777 }
 0x3dc   :  { %v796_v10 = vmax.f32 %v778_v9, 1e-24 }
 0x3dd   :  { %v772_v12 = vpop.xlane.xlu1 %771 }
 0x3de   :  { %1980 = vrsqrt.f32 %v796_v10  ;;  %v794_v15 = vmax.f32 %v772_v12, 1e-24 }
 0x3df   :  { %v781_v11 = vpop.xlane.xlu0 %780 }
 0x3e0   :  { %1982 = vrsqrt.f32 %v794_v15  ;;  %v797_v18 = vmax.f32 %v781_v11, 1e-24 }
 0x3e1   :  { %v775_v19 = vpop.xlane.xlu1 %774 }
 0x3e2   :  { %1984 = vrsqrt.f32 %v797_v18  ;;  %v795_v17 = vmax.f32 %v775_v19, 1e-24 }
 0x3e3   :  { %v766_v20 = vpop.xlane.xlu0 %765 }
 0x3e4   :  { %1986 = vrsqrt.f32 %v795_v17  ;;  %v792_v21 = vmax.f32 %v766_v20, 1e-24 }
 0x3e5   :  { %v769_v22 = vpop.xlane.xlu1 %768 }
 0x3e6   :  { %1988 = vrsqrt.f32 %v792_v21  ;;  %v793_v23 = vmax.f32 %v769_v22, 1e-24 }
 0x3e7   :  { %v760_v25 = vpop.xlane.xlu0 %759 }
 0x3e8   :  { %1990 = vrsqrt.f32 %v793_v23  ;;  %v790_v27 = vmax.f32 %v760_v25, 1e-24 }
 0x3e9   :  { %v763_v28 = vpop.xlane.xlu1 %762 }
 0x3ea   :  { %1992 = vrsqrt.f32 %v790_v27  ;;  %v791_v14 = vmax.f32 %v763_v28, 1e-24 }
 0x3eb   :  { %v1981_v16 = vpop.eup %1980  ;;  %v754_v31 = vpop.xlane.xlu0 %753 }
 0x3ec   :  { %1994 = vrsqrt.f32 %v791_v14  ;;  %v788_v34 = vmax.f32 %v754_v31, 1e-24  ;;  %v2380_v35 = vmul.f32 %v1981_v16, %v2297_v24 }
 0x3ed   :  { %v1983_v37 = vpop.eup %1982  ;;  %v757_v38 = vpop.xlane.xlu1 %756 }
 0x3ee   :  { %1996 = vrsqrt.f32 %v788_v34  ;;  %v789_v39 = vmax.f32 %v757_v38, 1e-24  ;;  %v2384_v41 = vrot.slane %v2380_v35, %v2269_v13  ;;  %v826_v42 = vmul.f32 %v1983_v37, %v2299_v26 }
 0x3ef   :  { %v1985_v44 = vpop.eup %1984  ;;  %v748_v45 = vpop.xlane.xlu0 %747 }
 0x3f0   :  { %1998 = vrsqrt.f32 %v789_v39  ;;  %v786_v47 = vmax.f32 %v748_v45, 1e-24  ;;  %v829_v48 = vmul.f32 %v1985_v44, %v2305_v30  ;;  %v2389_v50 = vmul.f32 %v2384_v41, %v826_v42 }
 0x3f1   :  { %v1987_v24 = vpop.eup %1986  ;;  %v751_v51 = vpop.xlane.xlu1 %750 }
 0x3f2   :  { %2000 = vrsqrt.f32 %v786_v47  ;;  %v787_v53 = vmax.f32 %v751_v51, 1e-24  ;;  %v2392_v54 = vpack.c.bf16 %v829_v48, %v2380_v35  ;;  %v2395_v56 = vmul.f32 %v2384_v41, %v829_v48 }
 0x3f3   :  { %v1989_v26 = vpop.eup %1988  ;;  %v742_v57 = vpop.xlane.xlu0 %741  ;;  %v827_v59 = vmul.f32 %v1987_v24, %v2312_v33 }
 0x3f4   :  { %2002 = vrsqrt.f32 %v787_v53  ;;  %v784_v60 = vmax.f32 %v742_v57, 1e-24  ;;  %1953 = vmatprep.subr.msk.bf16.mxu0 %vm733_vm1, %v2392_v54  ;;  %v860_v30 = vsel %vm733_vm1, %v2392_v54, 0  ;;  %v824_v3 = vmul.f32 %v1989_v26, %v2303_v29 }
 0x3f5   :  { %v1991_v62 = vpop.eup %1990  ;;  %1862 = vmatpush3.bf16.xpose.msra.mxu0 %v860_v30  ;;  %v745_v63 = vpop.xlane.xlu1 %744  ;;  %v2402_v1 = vpack.c.bf16 %v827_v59, %v826_v42  ;;  %v2405_v2 = vmul.f32 %v2384_v41, %v827_v59  ;;  %v2162_v59 = vmov 1.0  }
 0x3f6   :  { %2004 = vrsqrt.f32 %v784_v60  ;;  %v785_v33 = vmax.f32 %v745_v63, 1e-24  ;;  %v825_v4 = vmul.f32 %v1991_v62, %v2310_v32  ;;  %v2412_v7 = vmul.f32 %v2384_v41, %v824_v3  ;;  %1893 = vmatprep.subr.mxu1 %v2162_v59  ;;  %v2495_v62 = vld [vmem:[%s2810_s1 + $0x8] sm:$0xf]  ;;  %v2500_v63 = vld [vmem:[%s2810_s1 + $0x4] sm:$0xf] }
 0x3f7   :  { %v1993_v5 = vpop.eup %1992  ;;  %1954 = vmatprep.subr.msk.bf16.mxu0 %vm733_vm1, %v2402_v1  ;;  %v736_v6 = vpop.xlane.xlu0 %735  ;;  %v857_v19 = vsel %vm733_vm1, %v2402_v1, 0  ;;  %1894 = vmatpush3.msra.mxu1 %v2162_v59  ;;  %v2163_v60 = vmov 0  }
 0x3f8   :  { %2006 = vrsqrt.f32 %v785_v33  ;;  %v782_v8 = vmax.f32 %v736_v6, 1e-24  ;;  %v2415_v9 = vmul.f32 %v2384_v41, %v825_v4  ;;  %v822_v29 = vmul.f32 %v1993_v5, %v2317_v36  ;;  %1895 = vmatprep.subr.mxu1 %v2162_v59  ;;  %v2514_v5 = vld [vmem:[%s2810_s1 + $0x10] sm:$0xf] }
 0x3f9   :  { %v1995_v10 = vpop.eup %1994  ;;  %v739_v12 = vpop.xlane.xlu1 %738  ;;  %v835_v17 = vpack.c.bf16 %v825_v4, %v824_v3  ;;  %1896 = vmatpush3.msra.mxu1 %v2162_v59  ;;  %v2507_v3 = vld [vmem:[%s2810_s1 + $0xc] sm:$0xf]  ;;  %v992_v4 = vmin.bf16 %v2163_v60, %v2500_v63 }
 0x3fa   :  { %2008 = vrsqrt.f32 %v782_v8  ;;  %v783_v15 = vmax.f32 %v739_v12, 1e-24  ;;  %v823_v11 = vmul.f32 %v1995_v10, %v2324_v40  ;;  %v2420_v18 = vmul.f32 %v2384_v41, %v822_v29  ;;  %1897 = vmatprep.subr.mxu1 %v2162_v59 }
 0x3fb   :  { %v1997_v32 = vpop.eup %1996  ;;  %v854_v31 = vsel %vm733_vm1, %v835_v17, 0  ;;  %1898 = vmatpush3.msra.mxu1 %v2162_v59  ;;  %v994_v6 = vmin.bf16 %v2163_v60, %v2507_v3  ;;  %v995_v12 = vmin.bf16 %v2163_v60, %v2514_v5 }
 0x3fc   :  { %2010 = vrsqrt.f32 %v783_v15  ;;  %v2425_v20 = vmul.f32 %v1997_v32, %v2329_v43  ;;  %v2428_v36 = vmul.f32 %v2384_v41, %v823_v11  ;;  %1899 = vmatprep.subr.mxu1 %v2162_v59  ;;  %v1008_v15 = vmul.bf16 1900704074, %v992_v4  ;;  %v2523_v32 = vld [vmem:[%s2810_s1 + $0x18] sm:$0xf] }
 0x3fd   :  { %v1999_v21 = vpop.eup %1998  ;;  %1864 = vmatpush3.bf16.xpose.msra.mxu0 %v857_v19  ;;  %1900 = vmatpush3.msra.mxu1 %v2162_v59 }
 0x3fe   :  { %1955 = vmatprep.subr.msk.bf16.mxu0 %vm733_vm1, %v835_v17  ;;  %v821_v40 = vmul.f32 %v1999_v21, %v2334_v46  ;;  %v2434_v22 = vrot.slane %v2425_v20, %v2269_v13  ;;  %v834_v46 = vpack.c.bf16 %v823_v11, %v822_v29  ;;  %1901 = vmatprep.subr.mxu1 %v2162_v59  ;;  %v2528_v11 = vld [vmem:[%s2810_s1 + $0x14] sm:$0xf]  ;;  %v1010_v21 = vmul.bf16 1900704074, %v994_v6 }
 0x3ff   :  { %v2001_v23 = vpop.eup %2000  ;;  %1902 = vmatpush3.msra.mxu1 %v2162_v59 }
 0x400   :  { %v2437_v25 = vmul.f32 %v2434_v22, %v821_v40  ;;  %v818_v43 = vmul.f32 %v2001_v23, %v2339_v49  ;;  %v833_v48 = vpack.c.bf16 %v821_v40, %v2425_v20  ;;  %1903 = vmatprep.subr.mxu1 %v2162_v59  ;;  %v1011_v23 = vmul.bf16 1900704074, %v995_v12  ;;  %v2578_v12 = vld [vmem:[%s2810_s1 + $0x2c] sm:$0xf] }
 0x401   :  { %v2003_v27 = vpop.eup %2002  ;;  %1904 = vmatpush3.msra.mxu1 %v2162_v59 }
 0x402   :  { %v819_v28 = vmul.f32 %v2003_v27, %v2344_v52  ;;  %v2442_v14 = vmul.f32 %v2434_v22, %v818_v43  ;;  %1905 = vmatprep.subr.mxu1 %v2162_v59  ;;  %v996_v27 = vmin.bf16 %v2163_v60, %v2528_v11 }
 0x403   :  { %v2005_v16 = vpop.eup %2004  ;;  %1906 = vmatpush3.msra.mxu1 %v2162_v59 }
 0x404   :  { %v2446_v34 = vmul.f32 %v2434_v22, %v819_v28  ;;  %v816_v37 = vmul.f32 %v2005_v16, %v2349_v55  ;;  %v851_v55 = vsel %vm733_vm1, %v834_v46, 0  ;;  %v832_v51 = vpack.c.bf16 %v819_v28, %v818_v43  ;;  %1907 = vmatprep.subr.mxu1 %v2162_v59 }
 0x405   :  { %v2007_v13 = vpop.eup %2006  ;;  %1866 = vmatpush3.bf16.xpose.msra.mxu0 %v854_v31  ;;  %1908 = vmatpush3.msra.mxu1 %v2162_v59  ;;  %v997_v43 = vmin.bf16 %v2163_v60, %v2523_v32 }
 0x406   :  { %1956 = vmatprep.subr.msk.bf16.mxu0 %vm733_vm1, %v834_v46  ;;  %v817_v49 = vmul.f32 %v2007_v13, %v2354_v58  ;;  %v2452_v52 = vmul.f32 %v2434_v22, %v816_v37  ;;  %1909 = vmatprep.subr.mxu1 %v2162_v59  ;;  %v2542_v13 = vld [vmem:[%s2810_s1 + $0x1c] sm:$0xf] }
 0x407   :  { %v2009_v38 = vpop.eup %2008  ;;  %1910 = vmatpush3.msra.mxu1 %v2162_v59 }
 0x408   :  { %v814_v39 = vmul.f32 %v2009_v38, %v2360_v61  ;;  %v2456_v42 = vmul.f32 %v2434_v22, %v817_v49  ;;  %v848_v61 = vsel %vm733_vm1, %v833_v48, 0  ;;  %v831_v53 = vpack.c.bf16 %v817_v49, %v816_v37  ;;  %1911 = vmatprep.subr.mxu1 %v2162_v59  ;;  %v2547_v49 = vld [vmem:[%s2810_s1 + $0x20] sm:$0xf] }
 0x409   :  { %v2011_v44 = vpop.eup %2010  ;;  %1912 = vmatpush3.msra.mxu1 %v2162_v59 }
 0x40a   :  { %v815_v45 = vmul.f32 %v2011_v44, %v2366_v0  ;;  %v2460_v47 = vmul.f32 %v2434_v22, %v814_v39  ;;  %v845_v0 = vsel %vm733_vm1, %v832_v51, 0  ;;  %v842_v26 = vsel %vm733_vm1, %v831_v53, 0  ;;  %1913 = vmatprep.subr.mxu1 %v2162_v59 }
 0x40b   :  { %1914 = vmatpush3.msra.mxu1 %v2162_v59 }
 0x40c   :  { %v830_v58 = vpack.c.bf16 %v815_v45, %v814_v39  ;;  %v2465_v24 = vmul.f32 %v2434_v22, %v815_v45  ;;  %1915 = vmatprep.subr.mxu1 %v2162_v59  ;;  %v1042_v39 = vunpack.c.l.bf16 %v1010_v21  ;;  %v1043_v45 = vunpack.c.l.bf16 %v1011_v23 }
 0x40d   :  { %1868 = vmatpush3.bf16.xpose.msra.mxu0 %v851_v55  ;;  %1916 = vmatpush3.msra.mxu1 %v2162_v59  ;;  %v1013_v55 = vmul.bf16 1900704074, %v997_v43 }
 0x40e   :  { %1957 = vmatprep.subr.msk.bf16.mxu0 %vm733_vm1, %v833_v48  ;;  %1877 = vmatprep.mubr.msk.bf16.mxu0 %vm733_vm1, %v830_v58  ;;  %v839_v57 = vsel %vm733_vm1, %v830_v58, 0 }
 0x40f   :  { %1917 = vmatprep.subr.mxu1 %v2162_v59  ;;  %v1045_v4 = vunpack.c.l.bf16 %v1013_v55 }
 0x410   :  { %1918 = vmatpush3.msra.mxu1 %v2162_v59 }
 0x411   :  { %1919 = vmatprep.subr.mxu1 %v2162_v59 }
 0x412   :  { %1920 = vmatpush3.msra.mxu1 %v2162_v59 }
 0x413   :  { %1921 = vmatprep.subr.mxu1 %v2162_v59 }
 0x414   :  { %1922 = vmatpush3.msra.mxu1 %v2162_v59 }
 0x415   :  { %1870 = vmatpush3.bf16.xpose.msra.mxu0 %v848_v61  ;;  %1923 = vmatprep.subr.mxu1 %v2162_v59  ;;  %v2556_v61 = vld [vmem:[%s2810_s1 + $0x28] sm:$0xf] }
 0x416   :  { %1958 = vmatprep.subr.msk.bf16.mxu0 %vm733_vm1, %v832_v51  ;;  %1924 = vmatpush3.msra.mxu1 %v2162_v59 }
 0x41d   :  { %1872 = vmatpush3.bf16.xpose.msra.mxu0 %v845_v0 }
 0x41e   :  { %1959 = vmatprep.subr.msk.bf16.mxu0 %vm733_vm1, %v831_v53 }
 0x425   :  { %1874 = vmatpush3.bf16.xpose.msra.mxu0 %v842_v26  ;;  %v999_v26 = vmin.bf16 %v2163_v60, %v2547_v49 }
 0x426   :  { %1960 = vmatprep.subr.msk.bf16.mxu0 %vm733_vm1, %v830_v58  ;;  %v998_v58 = vmin.bf16 %v2163_v60, %v2542_v13 }
 0x427   :  { %v1015_v21 = vmul.bf16 1900704074, %v999_v26  ;;  %v2608_v26 = vld [vmem:[%s2810_s1 + $0x34] sm:$0xf] }
 0x42d   :  { %1876 = vmatpush3.bf16.xpose.msra.mxu0 %v839_v57  ;;  %v2567_v57 = vld [vmem:[%s2810_s1 + $0x24] sm:$0xf] }
 0x434   :  { %1878 = vmatmul.mubr.msk.bf16.vlgmr.msra.gmra.mxu0 %vm733_vm1, %v831_v53 }
 0x435   :  { %1881 = vmatprep.mubr.msk.bf16.mxu0 %vm733_vm1, %v832_v51 }
 0x43c   :  { %1882 = vmatmul.mubr.msk.bf16.gmra.mxu0 %vm733_vm1, %v833_v48  ;;  %v1012_v48 = vmul.bf16 1900704074, %v996_v27 }
 0x43d   :  { %1885 = vmatprep.mubr.msk.bf16.mxu0 %vm733_vm1, %v834_v46  ;;  %v1040_v46 = vunpack.c.l.bf16 %v1008_v15 }
 0x43e   :  { %v1044_v6 = vunpack.c.l.bf16 %v1012_v48  ;;  %v1047_v48 = vunpack.c.l.bf16 %v1015_v21 }
 0x444   :  { %1886 = vmatmul.mubr.msk.bf16.gmra.mxu0 %vm733_vm1, %v835_v17 }
 0x445   :  { %1889 = vmatprep.mubr.msk.bf16.mxu0 %vm733_vm1, %v2402_v1  ;;  %v993_v1 = vmin.bf16 %v2163_v60, %v2495_v62 }
 0x447   :  { %v1009_v10 = vmul.bf16 1900704074, %v993_v1  ;;  %v1001_v1 = vmin.bf16 %v2163_v60, %v2556_v61 }
 0x449   :  { %v1041_v31 = vunpack.c.l.bf16 %v1009_v10  ;;  %v1000_v10 = vmin.bf16 %v2163_v60, %v2567_v57  ;;  %v1017_v27 = vmul.bf16 1900704074, %v1001_v1 }
 0x44c   :  { %1890 = vmatmul.mubr.msk.bf16.gmra.mxu0 %vm733_vm1, %v2392_v54  ;;  %v2488_v54 = vld [vmem:[%s2810_s1] sm:$0xf] }
 0x44d   :  { %v991_v30 = vmin.bf16 %v2163_v60, %v2488_v54 }
 0x44f   :  { %v1007_v33 = vmul.bf16 1900704074, %v991_v30 }
 0x451   :  { %v1039_v29 = vunpack.c.l.bf16 %v1007_v33 }
 0x4f4   :  { %v1879_v8 = vpop.f32.mrf.mxu0 }
 0x4f5   :  { %v2536_v28 = vmul.f32 2.0, %v1879_v8  ;;  %v1014_v8 = vmul.bf16 1900704074, %v998_v58  ;;  %v2602_v58 = vld [vmem:[%s2810_s1 + $0x38] sm:$0xf] }
 0x4f6   :  { %v896_v19 = vpop.f32.mrf.mxu0 }
 0x4f7   :  { %v2530_v17 = vmul.f32 2.0, %v896_v19  ;;  %v1057_v0 = vadd.f32 %v1041_v31, %v2536_v28  ;;  %v1046_v31 = vunpack.c.l.bf16 %v1014_v8 }
 0x4f8   :  { %v1880_v40 = vpop.f32.mrf.mxu0 }
 0x4f9   :  { %v1055_v16 = vadd.f32 %v1039_v29, %v2530_v17  ;;  %v2558_v51 = vmul.f32 2.0, %v1880_v40  ;;  %v2587_v40 = vld [vmem:[%s2810_s1 + $0x30] sm:$0xf] }
 0x4fa   :  { %v899_v37 = vpop.f32.mrf.mxu0 }
 0x4fb   :  { %v2549_v38 = vmul.f32 2.0, %v899_v37  ;;  %1071 = vmax.xlane.f32.xlu0 %v1055_v16  ;;  %v1058_v15 = vadd.f32 %v1042_v39, %v2558_v51  ;;  %v1002_v37 = vmin.bf16 %v2163_v60, %v2578_v12  ;;  %v1003_v39 = vmin.bf16 %v2163_v60, %v2587_v40 }
 0x4fc   :  { %v1883_v44 = vpop.f32.mrf.mxu0 }
 0x4fd   :  { %v1056_v53 = vadd.f32 %v1040_v46, %v2549_v38  ;;  %v2580_v29 = vmul.f32 2.0, %v1883_v44  ;;  %v1016_v46 = vmul.bf16 1900704074, %v1000_v10  ;;  %v1018_v8 = vmul.bf16 1900704074, %v1002_v37 }
 0x4fe   :  { %v912_v59 = vpop.f32.mrf.mxu0  ;;  %v1019_v10 = vmul.bf16 1900704074, %v1003_v39 }
 0x4ff   :  { %v2569_v30 = vmul.f32 2.0, %v912_v59  ;;  %1075 = vmax.xlane.f32.xlu0 %v1057_v0  ;;  %1073 = vmax.xlane.f32.xlu1 %v1056_v53  ;;  %v1356_v0 = vmul.f32 1.442695, %v2460_v47  ;;  %v1495_v59 = vmul.f32 1.442695, %v2420_v18  ;;  %v1005_v47 = vmin.bf16 %v2163_v60, %v2602_v58 }
 0x500   :  { %v1884_v33 = vpop.f32.mrf.mxu0  ;;  %v1004_v18 = vmin.bf16 %v2163_v60, %v2608_v26  ;;  %v1050_v39 = vunpack.c.l.bf16 %v1018_v8  ;;  %v1499_v8 = vmul.f32 1.442695, %v2412_v7  ;;  %v1501_v7 = vmul.f32 1.442695, %v2415_v9 }
 0x501   :  { %v1059_v19 = vadd.f32 %v1043_v45, %v2569_v30  ;;  %v2595_v44 = vmul.f32 2.0, %v1884_v33  ;;  %v1061_v45 = vadd.f32 %v1045_v4, %v2580_v29  ;;  %v1049_v33 = vunpack.c.l.bf16 %v1017_v27 }
 0x502   :  { %v915_v23 = vpop.f32.mrf.mxu0  ;;  %2012 = vpow2.f32 %v1356_v0  ;;  %v1358_v27 = vmul.f32 1.442695, %v2465_v24  ;;  %v1366_v9 = vmul.f32 1.442695, %v2446_v34 }
 0x503   :  { %v2589_v43 = vmul.f32 2.0, %v915_v23  ;;  %1077 = vmax.xlane.f32.xlu1 %v1058_v15  ;;  %1079 = vmax.xlane.f32.xlu0 %v1059_v19  ;;  %v1062_v19 = vadd.f32 %v1046_v31, %v2595_v44  ;;  %v2624_v23 = vld [vmem:[%s2810_s1 + $0x3c] sm:$0xf]  ;;  %2014 = vpow2.f32 %v1495_v59  ;;  %v1020_v59 = vmul.bf16 1900704074, %v1004_v18 }
 0x504   :  { %v1887_v16 = vpop.f32.mrf.mxu0  ;;  %2016 = vpow2.f32 %v1358_v27 }
 0x505   :  { %v1060_v55 = vadd.f32 %v1044_v6, %v2589_v43  ;;  %v1048_v6 = vunpack.c.l.bf16 %v1016_v46  ;;  %v2615_v15 = vmul.f32 2.0, %v1887_v16  ;;  %v1497_v16 = vmul.f32 1.442695, %v2428_v36 }
 0x506   :  { %v928_v53 = vpop.f32.mrf.mxu0  ;;  %v1360_v36 = vmul.f32 1.442695, %v2452_v52  ;;  %v1052_v18 = vunpack.c.l.bf16 %v1020_v59  ;;  %v1362_v52 = vmul.f32 1.442695, %v2456_v42 }
 0x507   :  { %v2611_v1 = vmul.f32 2.0, %v928_v53  ;;  %1083 = vmax.xlane.f32.xlu0 %v1061_v45  ;;  %1081 = vmax.xlane.f32.xlu1 %v1060_v55  ;;  %v1051_v45 = vunpack.c.l.bf16 %v1019_v10  ;;  %v1021_v55 = vmul.bf16 1900704074, %v1005_v47  ;;  %v1065_v0 = vadd.f32 %v1049_v33, %v2615_v15 }
 0x508   :  { %v1888_v4 = vpop.f32.mrf.mxu0  ;;  %2018 = vpow2.f32 %v1497_v16 }
 0x509   :  { %v1063_v21 = vadd.f32 %v1047_v48, %v2611_v1  ;;  %v1006_v48 = vmin.bf16 %v2163_v60, %v2624_v23  ;;  %v2632_v53 = vmul.f32 2.0, %v1888_v4  ;;  %v1053_v47 = vunpack.c.l.bf16 %v1021_v55 }
 0x50a   :  { %v931_v46 = vpop.f32.mrf.mxu0  ;;  %2020 = vpow2.f32 %v1360_v36  ;;  %v1354_v36 = vmul.f32 %v2434_v22, %v2425_v20 }
 0x50b   :  { %v2628_v37 = vmul.f32 2.0, %v931_v46  ;;  %1085 = vmax.xlane.f32.xlu1 %v1062_v19  ;;  %1087 = vmax.xlane.f32.xlu0 %v1063_v21  ;;  %v1022_v4 = vmul.bf16 1900704074, %v1006_v48  ;;  %v1066_v33 = vadd.f32 %v1050_v39, %v2632_v53  ;;  %2022 = vpow2.f32 %v1499_v8 }
 0x50c   :  { %v1891_v31 = vpop.f32.mrf.mxu0  ;;  %2024 = vpow2.f32 %v1362_v52  ;;  %v1509_v52 = vmul.f32 1.442695, %v2395_v56 }
 0x50d   :  { %v1064_v24 = vadd.f32 %v1048_v6, %v2628_v37  ;;  %v2640_v21 = vmul.f32 2.0, %v1891_v31  ;;  %v1054_v55 = vunpack.c.l.bf16 %v1022_v4  ;;  %2026 = vpow2.f32 %v1501_v7 }
 0x50e   :  { %v944_v46 = vpop.f32.mrf.mxu0  ;;  %v1368_v4 = vmul.f32 1.442695, %v1354_v36 }
 0x50f   :  { %v2637_v19 = vmul.f32 2.0, %v944_v46  ;;  %1091 = vmax.xlane.f32.xlu0 %v1065_v0  ;;  %1089 = vmax.xlane.f32.xlu1 %v1064_v24  ;;  %v1069_v31 = vadd.f32 %v1053_v47, %v2640_v21  ;;  %v2013_v48 = vpop.eup %2012  ;;  %v1503_v0 = vmul.f32 1.442695, %v2389_v50  ;;  %v1493_v50 = vmul.f32 %v2384_v41, %v2380_v35 }
 0x510   :  { %v1892_v10 = vpop.f32.mrf.mxu0  ;;  %v2015_v42 = vpop.eup %2014  ;;  %v1372_v59 = vsel %vm733_vm1, %v2013_v48, 0.0 }
 0x511   :  { %v1067_v6 = vadd.f32 %v1051_v45, %v2637_v19  ;;  %v2648_v16 = vmul.f32 2.0, %v1892_v10  ;;  %v1364_v45 = vmul.f32 1.442695, %v2442_v14  ;;  %v2017_v8 = vpop.eup %2016  ;;  %v1505_v10 = vmul.f32 1.442695, %v2405_v2 }
 0x512   :  { %v947_v27 = vpop.f32.mrf.mxu0  ;;  %v1511_v47 = vsel %vm733_vm1, %v2015_v42, 0.0  ;;  %v1375_v34 = vsel %vm733_vm1, %v2017_v8, 0.0  ;;  %v1507_v22 = vmul.f32 1.442695, %v1493_v50 }
 0x513   :  { %v2645_v46 = vmul.f32 2.0, %v947_v27  ;;  %1093 = vmax.xlane.f32.xlu1 %v1066_v33  ;;  %1095 = vmax.xlane.f32.xlu0 %v1067_v6  ;;  %v1070_v24 = vadd.f32 %v1054_v55, %v2648_v16  ;;  %2028 = vpow2.f32 %v1364_v45  ;;  %v1370_v6 = vmul.f32 1.442695, %v2437_v25 }
 0x514   :  { %2030 = vpow2.f32 %v1503_v0 }
 0x515   :  { %v1068_v39 = vadd.f32 %v1052_v18, %v2645_v46  ;;  %v2019_v14 = vpop.eup %2018  ;;  %2032 = vpow2.f32 %v1366_v9 }
 0x516   :  { %2034 = vpow2.f32 %v1505_v10  ;;  %v1514_v2 = vsel %vm733_vm1, %v2019_v14, 0.0 }
 0x517   :  { %1099 = vmax.xlane.f32.xlu0 %v1069_v31  ;;  %1097 = vmax.xlane.f32.xlu1 %v1068_v39  ;;  %v2021_v33 = vpop.eup %2020  ;;  %2036 = vpow2.f32 %v1368_v4 }
 0x518   :  { %v2023_v20 = vpop.eup %2022  ;;  %v1378_v18 = vsel %vm733_vm1, %v2021_v33, 0.0  ;;  %2038 = vpow2.f32 %v1507_v22 }
 0x519   :  { %v2025_v35 = vpop.eup %2024  ;;  %2040 = vpow2.f32 %v1370_v6  ;;  %v1517_v7 = vsel %vm733_vm1, %v2023_v20, 0.0 }
 0x51a   :  { %v2027_v41 = vpop.eup %2026  ;;  %v1381_v27 = vsel %vm733_vm1, %v2025_v35, 0.0  ;;  %2042 = vpow2.f32 %v1509_v52 }
 0x51b   :  { %1373 = vadd.xlane.f32.xlu0 %v1372_v59  ;;  %1101 = vmax.xlane.f32.xlu1 %v1070_v24  ;;  %v1520_v55 = vsel %vm733_vm1, %v2027_v41, 0.0 }
 0x51f   :  { %1512 = vadd.xlane.f32.xlu0 %v1511_v47  ;;  %1376 = vadd.xlane.f32.xlu1 %v1375_v34 }
 0x520   :  { %v2029_v31 = vpop.eup %2028 }
 0x521   :  { %v2031_v25 = vpop.eup %2030  ;;  %v1384_v39 = vsel %vm733_vm1, %v2029_v31, 0.0  ;;  %v1023_v31 = vmax.bf16 %v2163_v60, %v2488_v54 }
 0x522   :  { %v2033_v45 = vpop.eup %2032  ;;  %v1523_v42 = vsel %vm733_vm1, %v2031_v25, 0.0 }
 0x523   :  { %1379 = vadd.xlane.f32.xlu0 %v1378_v18  ;;  %1515 = vadd.xlane.f32.xlu1 %v1514_v2  ;;  %v2035_v48 = vpop.eup %2034  ;;  %v1387_v56 = vsel %vm733_vm1, %v2033_v45, 0.0 }
 0x524   :  { %v2037_v0 = vpop.eup %2036  ;;  %v1526_v59 = vsel %vm733_vm1, %v2035_v48, 0.0  ;;  %v1151_v48 = vunpack.c.l.bf16 %v1023_v31 }
 0x525   :  { %v2039_v24 = vpop.eup %2038  ;;  %v1390_v9 = vsel %vm733_vm1, %v2037_v0, 0.0 }
 0x526   :  { %v2041_v36 = vpop.eup %2040  ;;  %v1529_v14 = vsel %vm733_vm1, %v2039_v24, 0.0 }
 0x527   :  { %1382 = vadd.xlane.f32.xlu0 %v1381_v27  ;;  %1518 = vadd.xlane.f32.xlu1 %v1517_v7  ;;  %v1393_v8 = vsel %vm733_vm1, %v2041_v36, 0.0  ;;  %v2043_v10 = vpop.eup %2042 }
 0x528   :  { %v1532_v50 = vsel %vm733_vm1, %v2043_v10, 0.0 }
 0x52b   :  { %1385 = vadd.xlane.f32.xlu0 %v1384_v39  ;;  %1521 = vadd.xlane.f32.xlu1 %v1520_v55 }
 0x52f   :  { %1388 = vadd.xlane.f32.xlu0 %v1387_v56  ;;  %1524 = vadd.xlane.f32.xlu1 %v1523_v42 }
 0x533   :  { %1391 = vadd.xlane.f32.xlu0 %v1390_v9  ;;  %1527 = vadd.xlane.f32.xlu1 %v1526_v59 }
 0x537   :  { %1394 = vadd.xlane.f32.xlu0 %v1393_v8  ;;  %1530 = vadd.xlane.f32.xlu1 %v1529_v14 }
 0x53b   :  { %1533 = vadd.xlane.f32.xlu1 %v1532_v50 }
 0x584   :  { %v1072_v47 = vpop.xlane.xlu0 %1071 }
 0x585   :  { %v1103_v34 = vsub.f32 %v2530_v17, %v1072_v47 }
 0x587   :  { %v1119_v4 = vmul.f32 1.442695, %v1103_v34 }
 0x588   :  { %v1076_v33 = vpop.xlane.xlu0 %1075  ;;  %v1074_v20 = vpop.xlane.xlu1 %1073 }
 0x589   :  { %2044 = vpow2.f32 %v1119_v4  ;;  %v1105_v22 = vsub.f32 %v2536_v28, %v1076_v33  ;;  %v1104_v6 = vsub.f32 %v2549_v38, %v1074_v20  ;;  %v1029_v33 = vmax.bf16 %v2163_v60, %v2523_v32 }
 0x58b   :  { %v1123_v18 = vmul.f32 1.442695, %v1105_v22  ;;  %v1121_v2 = vmul.f32 1.442695, %v1104_v6 }
 0x58c   :  { %v1078_v35 = vpop.xlane.xlu1 %1077  ;;  %v1080_v41 = vpop.xlane.xlu0 %1079 }
 0x58d   :  { %2046 = vpow2.f32 %v1123_v18  ;;  %v1106_v52 = vsub.f32 %v2558_v51, %v1078_v35  ;;  %v1107_v27 = vsub.f32 %v2569_v30, %v1080_v41  ;;  %v1025_v51 = vmax.bf16 %v2163_v60, %v2495_v62 }
 0x58e   :  { %2048 = vpow2.f32 %v1121_v2  ;;  %v1024_v30 = vmax.bf16 %v2163_v60, %v2500_v63  ;;  %v1027_v63 = vmax.bf16 %v2163_v60, %v2514_v5  ;;  %v1030_v35 = vmax.bf16 %v2163_v60, %v2542_v13 }
 0x58f   :  { %v1125_v7 = vmul.f32 1.442695, %v1106_v52  ;;  %v1127_v17 = vmul.f32 1.442695, %v1107_v27  ;;  %v1153_v36 = vunpack.c.l.bf16 %v1025_v51  ;;  %v1033_v51 = vmax.bf16 %v2163_v60, %v2556_v61 }
 0x590   :  { %v1084_v25 = vpop.xlane.xlu0 %1083  ;;  %v1082_v39 = vpop.xlane.xlu1 %1081  ;;  %v1152_v62 = vunpack.c.l.bf16 %v1024_v30  ;;  %v1155_v5 = vunpack.c.l.bf16 %v1027_v63  ;;  %v1158_v13 = vunpack.c.l.bf16 %v1030_v35  ;;  %v1034_v61 = vmax.bf16 %v2163_v60, %v2578_v12 }
 0x591   :  { %2050 = vpow2.f32 %v1125_v7  ;;  %v1109_v28 = vsub.f32 %v2580_v29, %v1084_v25  ;;  %v1108_v38 = vsub.f32 %v2589_v43, %v1082_v39  ;;  %v1026_v43 = vmax.bf16 %v2163_v60, %v2507_v3 }
 0x592   :  { %2052 = vpow2.f32 %v1127_v17  ;;  %v1157_v7 = vunpack.c.l.bf16 %v1029_v33  ;;  %v1036_v12 = vmax.bf16 %v2163_v60, %v2608_v26 }
 0x593   :  { %v1131_v55 = vmul.f32 1.442695, %v1109_v28  ;;  %v1129_v45 = vmul.f32 1.442695, %v1108_v38  ;;  %v1154_v50 = vunpack.c.l.bf16 %v1026_v43  ;;  %v1161_v43 = vunpack.c.l.bf16 %v1033_v51 }
 0x594   :  { %v1086_v56 = vpop.xlane.xlu1 %1085  ;;  %v1088_v42 = vpop.xlane.xlu0 %1087 }
 0x595   :  { %2054 = vpow2.f32 %v1131_v55  ;;  %v1110_v54 = vsub.f32 %v2595_v44, %v1086_v56  ;;  %v1111_v0 = vsub.f32 %v2611_v1, %v1088_v42 }
 0x596   :  { %v2045_v29 = vpop.eup %2044  ;;  %2056 = vpow2.f32 %v1129_v45 }
 0x597   :  { %v1133_v24 = vmul.f32 1.442695, %v1110_v54  ;;  %v1135_v9 = vmul.f32 1.442695, %v1111_v0  ;;  %v1167_v59 = vmul.f32 %v2045_v29, %v1151_v48 }
 0x598   :  { %v1092_v8 = vpop.xlane.xlu0 %1091  ;;  %v1090_v14 = vpop.xlane.xlu1 %1089 }
 0x599   :  { %2058 = vpow2.f32 %v1133_v24  ;;  %v1113_v44 = vsub.f32 %v2615_v15, %v1092_v8  ;;  %v1112_v1 = vsub.f32 %v2628_v37, %v1090_v14  ;;  %1925 = vmatprep.mubr.f32.mxu1 %v1167_v59  ;;  %v1028_v15 = vmax.bf16 %v2163_v60, %v2528_v11 }
 0x59a   :  { %v2047_v10 = vpop.eup %2046  ;;  %2060 = vpow2.f32 %v1135_v9  ;;  %v1035_v59 = vmax.bf16 %v2163_v60, %v2587_v40  ;;  %v1037_v8 = vmax.bf16 %v2163_v60, %v2602_v58 }
 0x59b   :  { %v2049_v3 = vpop.eup %2048  ;;  %v1139_v47 = vmul.f32 1.442695, %v1113_v44  ;;  %v1137_v34 = vmul.f32 1.442695, %v1112_v1  ;;  %v1169_v4 = vmul.f32 %v2047_v10, %v1153_v36  ;;  %v1156_v25 = vunpack.c.l.bf16 %v1028_v15 }
 0x59c   :  { %v1094_v20 = vpop.xlane.xlu1 %1093  ;;  %v1096_v22 = vpop.xlane.xlu0 %1095  ;;  %v1168_v6 = vmul.f32 %v2049_v3, %v1152_v62  ;;  %v1162_v62 = vunpack.c.l.bf16 %v1034_v61  ;;  %v1163_v63 = vunpack.c.l.bf16 %v1035_v59  ;;  %v1165_v10 = vunpack.c.l.bf16 %v1037_v8 }
 0x59d   :  { %2062 = vpow2.f32 %v1139_v47  ;;  %v1114_v37 = vsub.f32 %v2632_v53, %v1094_v20  ;;  %v1115_v18 = vsub.f32 %v2637_v19, %v1096_v22  ;;  %v1031_v53 = vmax.bf16 %v2163_v60, %v2547_v49 }
 0x59e   :  { %v2051_v2 = vpop.eup %2050  ;;  %2064 = vpow2.f32 %v1137_v34  ;;  %1926 = vmatmul.mubr.f32.vlgmr.msra.gmra.mxu1 %v1168_v6  ;;  %v1164_v47 = vunpack.c.l.bf16 %v1036_v12 }
 0x59f   :  { %v2053_v41 = vpop.eup %2052  ;;  %v1141_v32 = vmul.f32 1.442695, %v1114_v37  ;;  %v1143_v52 = vmul.f32 1.442695, %v1115_v18  ;;  %1928 = vmatprep.mubr.f32.mxu1 %v1169_v4  ;;  %v1170_v27 = vmul.f32 %v2051_v2, %v1154_v50  ;;  %v1159_v49 = vunpack.c.l.bf16 %v1031_v53 }
 0x5a0   :  { %v1100_v17 = vpop.xlane.xlu0 %1099  ;;  %v1098_v31 = vpop.xlane.xlu1 %1097  ;;  %v1171_v11 = vmul.f32 %v2053_v41, %v1155_v5  ;;  %v1038_v50 = vmax.bf16 %v2163_v60, %v2624_v23 }
 0x5a1   :  { %2066 = vpow2.f32 %v1141_v32  ;;  %v1117_v19 = vsub.f32 %v2640_v21, %v1100_v17  ;;  %v1116_v39 = vsub.f32 %v2645_v46, %v1098_v31  ;;  %v1032_v21 = vmax.bf16 %v2163_v60, %v2567_v57 }
 0x5a2   :  { %v2055_v28 = vpop.eup %2054  ;;  %2068 = vpow2.f32 %v1143_v52  ;;  %1929 = vmatmul.mubr.f32.gmra.mxu1 %v1170_v27  ;;  %v1166_v33 = vunpack.c.l.bf16 %v1038_v50 }
 0x5a3   :  { %v2057_v38 = vpop.eup %2056  ;;  %v1147_v55 = vmul.f32 1.442695, %v1117_v19  ;;  %v1145_v45 = vmul.f32 1.442695, %v1116_v39  ;;  %1931 = vmatprep.mubr.f32.mxu1 %v1171_v11  ;;  %v1173_v48 = vmul.f32 %v2055_v28, %v1157_v7  ;;  %v1160_v9 = vunpack.c.l.bf16 %v1032_v21 }
 0x5a4   :  { %v1102_v30 = vpop.xlane.xlu1 %1101  ;;  %v1172_v56 = vmul.f32 %v2057_v38, %v1156_v25  ;;  %v1374_v6 = vpop.xlane.xlu0 %1373 }
 0x5a5   :  { %2070 = vpow2.f32 %v1147_v55  ;;  %v1118_v46 = vsub.f32 %v2648_v16, %v1102_v30 }
 0x5a6   :  { %v2059_v42 = vpop.eup %2058  ;;  %2072 = vpow2.f32 %v1145_v45  ;;  %1932 = vmatmul.mubr.f32.gmra.mxu1 %v1172_v56 }
 0x5a7   :  { %v2061_v54 = vpop.eup %2060  ;;  %v1149_v0 = vmul.f32 1.442695, %v1118_v46  ;;  %1934 = vmatprep.mubr.f32.mxu1 %v1173_v48  ;;  %v1174_v29 = vmul.f32 %v2059_v42, %v1158_v13 }
 0x5a8   :  { %v1175_v24 = vmul.f32 %v2061_v54, %v1159_v49  ;;  %v2727_v5 = vpop.xlane.xlu0 %1512  ;;  %v1377_v18 = vpop.xlane.xlu1 %1376 }
 0x5a9   :  { %2074 = vpow2.f32 %v1149_v0 }
 0x5aa   :  { %v2063_v57 = vpop.eup %2062  ;;  %1935 = vmatmul.mubr.f32.gmra.mxu1 %v1174_v29 }
 0x5ab   :  { %v2065_v16 = vpop.eup %2064  ;;  %1937 = vmatprep.mubr.f32.mxu1 %v1175_v24  ;;  %v1177_v36 = vmul.f32 %v2063_v57, %v1161_v43 }
 0x5ac   :  { %v1176_v14 = vmul.f32 %v2065_v16, %v1160_v9  ;;  %v1380_v15 = vpop.xlane.xlu0 %1379  ;;  %v2729_v17 = vpop.xlane.xlu1 %1515 }
 0x5ae   :  { %v2067_v44 = vpop.eup %2066  ;;  %1938 = vmatmul.mubr.f32.gmra.mxu1 %v1176_v14 }
 0x5af   :  { %v2069_v1 = vpop.eup %2068  ;;  %1940 = vmatprep.mubr.f32.mxu1 %v1177_v36  ;;  %v1178_v40 = vmul.f32 %v2067_v44, %v1162_v62 }
 0x5b0   :  { %v1179_v3 = vmul.f32 %v2069_v1, %v1163_v63  ;;  %v1383_v35 = vpop.xlane.xlu0 %1382  ;;  %v2731_v13 = vpop.xlane.xlu1 %1518 }
 0x5b2   :  { %v2071_v34 = vpop.eup %2070  ;;  %1941 = vmatmul.mubr.f32.gmra.mxu1 %v1178_v40 }
 0x5b3   :  { %v2073_v4 = vpop.eup %2072  ;;  %1943 = vmatprep.mubr.f32.mxu1 %v1179_v3  ;;  %v1181_v58 = vmul.f32 %v2071_v34, %v1165_v10 }
 0x5b4   :  { %v1180_v20 = vmul.f32 %v2073_v4, %v1164_v47  ;;  %v1386_v11 = vpop.xlane.xlu0 %1385  ;;  %v2733_v29 = vpop.xlane.xlu1 %1521 }
 0x5b6   :  { %v2075_v22 = vpop.eup %2074  ;;  %1944 = vmatmul.mubr.f32.gmra.mxu1 %v1180_v20 }
 0x5b7   :  { %1946 = vmatprep.mubr.f32.mxu1 %v1181_v58  ;;  %v1182_v26 = vmul.f32 %v2075_v22, %v1166_v33 }
 0x5b8   :  { %v1389_v45 = vpop.xlane.xlu0 %1388  ;;  %v2735_v10 = vpop.xlane.xlu1 %1524 }
 0x5ba   :  { %1947 = vmatmul.mubr.f32.gmra.mxu1 %v1182_v26 }
 0x5bc   :  { %v1392_v59 = vpop.xlane.xlu0 %1391 }
 0x5c0   :  { %v1395_v4 = vpop.xlane.xlu0 %1394 }
 0x65e   :  { %v1927_v37 = vpop.f32.mrf.mxu1 }
 0x65f   :  { %v1397_v60 = vadd.f32 1e-06, %v1927_v37 }
 0x660   :  { %v1249_v23 = vpop.f32.mrf.mxu1 }
 0x661   :  { %2076 = vrcp.f32 %v1397_v60  ;;  %v1396_v2 = vadd.f32 1e-06, %v1249_v23 }
 0x662   :  { %v1930_v41 = vpop.f32.mrf.mxu1 }
 0x663   :  { %2078 = vrcp.f32 %v1396_v2  ;;  %v1399_v32 = vadd.f32 1e-06, %v1930_v41 }
 0x664   :  { %v1259_v52 = vpop.f32.mrf.mxu1 }
 0x665   :  { %2080 = vrcp.f32 %v1399_v32  ;;  %v1398_v27 = vadd.f32 1e-06, %v1259_v52 }
 0x666   :  { %v1933_v7 = vpop.f32.mrf.mxu1 }
 0x667   :  { %2082 = vrcp.f32 %v1398_v27  ;;  %v1401_v31 = vadd.f32 1e-06, %v1933_v7 }
 0x668   :  { %v1269_v25 = vpop.f32.mrf.mxu1 }
 0x669   :  { %2084 = vrcp.f32 %v1401_v31  ;;  %v1400_v53 = vadd.f32 1e-06, %v1269_v25  ;;  %v1329_v25 = vld [vmem:[%s2811_s2 + $0x8] sm:$0xff] }
 0x66a   :  { %v1936_v19 = vpop.f32.mrf.mxu1 }
 0x66b   :  { %2086 = vrcp.f32 %v1400_v53  ;;  %v1403_v39 = vadd.f32 1e-06, %v1936_v19 }
 0x66c   :  { %v1279_v28 = vpop.f32.mrf.mxu1 }
 0x66d   :  { %2088 = vrcp.f32 %v1403_v39  ;;  %v1402_v38 = vadd.f32 1e-06, %v1279_v28 }
 0x66e   :  { %v2077_v55 = vpop.eup %2076  ;;  %v1939_v48 = vpop.f32.mrf.mxu1 }
 0x66f   :  { %v1413_v51 = vmul.f32 %v2077_v55, %v1377_v18  ;;  %2090 = vrcp.f32 %v1402_v38  ;;  %v1536_v30 = vadd.f32 1e-06, %v1939_v48  ;;  %v1528_v18 = vpop.xlane.xlu1 %1527 }
 0x670   :  { %v2079_v56 = vpop.eup %2078  ;;  %v1289_v49 = vpop.f32.mrf.mxu1 }
 0x671   :  { %v1421_v21 = vadd.f32 1e-06, %v1413_v51  ;;  %v1412_v46 = vmul.f32 %v2079_v56, %v1374_v6  ;;  %2092 = vrcp.f32 %v1536_v30  ;;  %v1535_v42 = vadd.f32 1e-06, %v1289_v49 }
 0x672   :  { %v2081_v54 = vpop.eup %2080  ;;  %v1942_v0 = vpop.f32.mrf.mxu1 }
 0x673   :  { %2094 = vlog2.f32 %v1421_v21  ;;  %v1420_v43 = vadd.f32 1e-06, %v1412_v46  ;;  %v1415_v61 = vmul.f32 %v2081_v54, %v1383_v35  ;;  %v1538_v24 = vadd.f32 1e-06, %v1942_v0 }
 0x674   :  { %v2083_v9 = vpop.eup %2082  ;;  %2096 = vrcp.f32 %v1535_v42  ;;  %v1299_v57 = vpop.f32.mrf.mxu1 }
 0x675   :  { %2098 = vlog2.f32 %v1420_v43  ;;  %v1423_v16 = vadd.f32 1e-06, %v1415_v61  ;;  %v1414_v36 = vmul.f32 %v2083_v9, %v1380_v15  ;;  %v1537_v62 = vadd.f32 1e-06, %v1299_v57  ;;  %v1330_v43 = vld [vmem:[%s2811_s2 + $0x10] sm:$0xff] }
 0x676   :  { %v2085_v8 = vpop.eup %2084  ;;  %2100 = vrcp.f32 %v1538_v24  ;;  %v1945_v14 = vpop.f32.mrf.mxu1 }
 0x677   :  { %2102 = vlog2.f32 %v1423_v16  ;;  %v1422_v63 = vadd.f32 1e-06, %v1414_v36  ;;  %v1417_v12 = vmul.f32 %v2085_v8, %v1389_v45  ;;  %v1540_v44 = vadd.f32 1e-06, %v1945_v14  ;;  %v1531_v45 = vpop.xlane.xlu1 %1530 }
 0x678   :  { %v2087_v1 = vpop.eup %2086  ;;  %2104 = vrcp.f32 %v1537_v62  ;;  %v1309_v40 = vpop.f32.mrf.mxu1 }
 0x679   :  { %2106 = vlog2.f32 %v1422_v63  ;;  %v1425_v50 = vadd.f32 1e-06, %v1417_v12  ;;  %v1416_v3 = vmul.f32 %v2087_v1, %v1386_v11  ;;  %v1539_v47 = vadd.f32 1e-06, %v1309_v40 }
 0x67a   :  { %v2089_v34 = vpop.eup %2088  ;;  %2108 = vrcp.f32 %v1540_v44  ;;  %v1948_v58 = vpop.f32.mrf.mxu1 }
 0x67b   :  { %2110 = vlog2.f32 %v1425_v50  ;;  %v1424_v33 = vadd.f32 1e-06, %v1416_v3  ;;  %v1419_v20 = vmul.f32 %v2089_v34, %v1395_v4  ;;  %v1542_v22 = vadd.f32 1e-06, %v1948_v58  ;;  %v1534_v63 = vpop.xlane.xlu1 %1533  ;;  %v1332_v4 = vld [vmem:[%s2811_s2 + $0x20] sm:$0xff] }
 0x67c   :  { %v2091_v26 = vpop.eup %2090  ;;  %2112 = vrcp.f32 %v1539_v47  ;;  %v1319_v6 = vpop.f32.mrf.mxu1 }
 0x67d   :  { %2114 = vlog2.f32 %v1424_v33  ;;  %v1427_v15 = vadd.f32 1e-06, %v1419_v20  ;;  %v1418_v37 = vmul.f32 %v2091_v26, %v1392_v59  ;;  %v1541_v60 = vadd.f32 1e-06, %v1319_v6 }
 0x67e   :  { %v2093_v23 = vpop.eup %2092  ;;  %2116 = vrcp.f32 %v1542_v22 }
 0x67f   :  { %2118 = vlog2.f32 %v1427_v15  ;;  %v1426_v2 = vadd.f32 1e-06, %v1418_v37  ;;  %v1552_v35 = vmul.f32 %v2093_v23, %v2729_v17  ;;  %v1328_v17 = vld [vmem:[%s2811_s2] sm:$0xff] }
 0x680   :  { %v2095_v41 = vpop.eup %2094  ;;  %2120 = vrcp.f32 %v1541_v60 }
 0x681   :  { %v2097_v32 = vpop.eup %2096  ;;  %v1431_v52 = vmul.f32 0.6931472, %v2095_v41  ;;  %2122 = vlog2.f32 %v1426_v2  ;;  %v1560_v27 = vadd.f32 1e-06, %v1552_v35  ;;  %v1334_v41 = vld [vmem:[%s2811_s2 + $0x30] sm:$0xff] }
 0x682   :  { %v2099_v7 = vpop.eup %2098  ;;  %v1551_v31 = vmul.f32 %v2097_v32, %v2727_v5 }
 0x683   :  { %v2101_v11 = vpop.eup %2100  ;;  %v1445_v53 = vsub.f32 0.0, %v1431_v52  ;;  %v1429_v19 = vmul.f32 0.6931472, %v2099_v7  ;;  %2124 = vlog2.f32 %v1560_v27 }
 0x684   :  { %v2103_v39 = vpop.eup %2102  ;;  %v1559_v28 = vadd.f32 1e-06, %v1551_v31  ;;  %v1554_v38 = vmul.f32 %v2101_v11, %v2733_v29  ;;  %v1331_v29 = vld [vmem:[%s2811_s2 + $0x18] sm:$0xff] }
 0x685   :  { %v2105_v55 = vpop.eup %2104  ;;  %v1444_v48 = vsub.f32 0.0, %v1429_v19  ;;  %v1435_v5 = vmul.f32 0.6931472, %v2103_v39  ;;  %v1453_v30 = vmul.f32 %v1445_v53, %v1329_v25 }
 0x686   :  { %v2107_v51 = vpop.eup %2106  ;;  %2126 = vlog2.f32 %v1559_v28  ;;  %v1562_v56 = vadd.f32 1e-06, %v1554_v38  ;;  %v1553_v49 = vmul.f32 %v2105_v55, %v2731_v13  ;;  %v1335_v28 = vld [vmem:[%s2811_s2 + $0x38] sm:$0xff] }
 0x687   :  { %v2109_v21 = vpop.eup %2108  ;;  %v1452_v46 = vmul.f32 %v1444_v48, %v1328_v17  ;;  %v1447_v42 = vsub.f32 0.0, %v1435_v5  ;;  %v1433_v54 = vmul.f32 0.6931472, %v2107_v51  ;;  %v1462_v36 = vsel %vm1460_vm2, %v1453_v30, 0.0  ;;  %v1336_v48 = vld [vmem:[%s2811_s2 + $0x40] sm:$0xff] }
 0x688   :  { %v2111_v0 = vpop.eup %2110  ;;  %2128 = vlog2.f32 %v1562_v56  ;;  %v1561_v61 = vadd.f32 1e-06, %v1553_v49  ;;  %v1556_v24 = vmul.f32 %v2109_v21, %v1528_v18 }
 0x689   :  { %v2113_v9 = vpop.eup %2112  ;;  %v1461_v13 = vsel %vm1460_vm2, %v1452_v46, 0.0  ;;  %v1446_v59 = vsub.f32 0.0, %v1433_v54  ;;  %v1439_v57 = vmul.f32 0.6931472, %v2111_v0  ;;  %v1455_v12 = vmul.f32 %v1447_v42, %v1331_v29  ;;  %v1339_v54 = vld [vmem:[%s2811_s2 + $0x58] sm:$0xff] }
 0x68a   :  { %v2115_v16 = vpop.eup %2114  ;;  %2130 = vlog2.f32 %v1561_v61  ;;  %v1564_v62 = vadd.f32 1e-06, %v1556_v24  ;;  %v1555_v8 = vmul.f32 %v2113_v9, %v2735_v10  ;;  %v1463_v40 = vadd.f32 %v1462_v36, %v1461_v13  ;;  %v1333_v10 = vld [vmem:[%s2811_s2 + $0x28] sm:$0xff]  ;;  %v1338_v61 = vld [vmem:[%s2811_s2 + $0x50] sm:$0xff] }
 0x68b   :  { %v2117_v14 = vpop.eup %2116  ;;  %v1454_v44 = vmul.f32 %v1446_v59, %v1330_v43  ;;  %v1437_v1 = vmul.f32 0.6931472, %v2115_v16  ;;  %v1449_v3 = vsub.f32 0.0, %v1439_v57  ;;  %v1466_v18 = vsel %vm1460_vm2, %v1455_v12, 0.0 }
 0x68c   :  { %v2119_v50 = vpop.eup %2118  ;;  %2132 = vlog2.f32 %v1564_v62  ;;  %v1563_v47 = vadd.f32 1e-06, %v1555_v8  ;;  %v1558_v34 = vmul.f32 %v2117_v14, %v1534_v63 }
 0x68d   :  { %v2121_v58 = vpop.eup %2120  ;;  %v1448_v33 = vsub.f32 0.0, %v1437_v1  ;;  %v1464_v20 = vsel %vm1460_vm2, %v1454_v44, 0.0  ;;  %v1443_v60 = vmul.f32 0.6931472, %v2119_v50  ;;  %v1457_v32 = vmul.f32 %v1449_v3, %v1333_v10  ;;  %v1340_v44 = vld [vmem:[%s2811_s2 + $0x60] sm:$0xff]  ;;  %v1341_v1 = vld [vmem:[%s2811_s2 + $0x68] sm:$0xff] }
 0x68e   :  { %v2123_v22 = vpop.eup %2122  ;;  %2134 = vlog2.f32 %v1563_v47  ;;  %v1566_v26 = vadd.f32 1e-06, %v1558_v34  ;;  %v1557_v6 = vmul.f32 %v2121_v58, %v1531_v45  ;;  %v1465_v15 = vadd.f32 %v1464_v20, %v1463_v40  ;;  %v1337_v45 = vld [vmem:[%s2811_s2 + $0x48] sm:$0xff] }
 0x68f   :  { %v1441_v37 = vmul.f32 0.6931472, %v2123_v22  ;;  %v1456_v23 = vmul.f32 %v1448_v33, %v1332_v4  ;;  %v1451_v53 = vsub.f32 0.0, %v1443_v60  ;;  %v1470_v38 = vsel %vm1460_vm2, %v1457_v32, 0.0 }
 0x690   :  { %v2125_v2 = vpop.eup %2124  ;;  %2136 = vlog2.f32 %v1566_v26  ;;  %v1565_v35 = vadd.f32 1e-06, %v1557_v6  ;;  %v1467_v52 = vadd.f32 %v1466_v18, %v1465_v15  ;;  %v1342_v6 = vld [vmem:[%s2811_s2 + $0x70] sm:$0xff]  ;;  %v1343_v15 = vld [vmem:[%s2811_s2 + $0x78] sm:$0xff]  ;;  %s2164_s2 = smov [#allocation2]  }
 0x691   :  { %v1570_v27 = vmul.f32 0.6931472, %v2125_v2  ;;  %v1450_v7 = vsub.f32 0.0, %v1441_v37  ;;  %v1468_v31 = vsel %vm1460_vm2, %v1456_v23, 0.0  ;;  %v1459_v21 = vmul.f32 %v1451_v53, %v1335_v28  ;;  %s1629_s30 = sshll.u32 %s2164_s2, 4  ;;  %s1630_s30 = int_to_ptr.vmem [resolvable:$true] %s1629_s30 }
 0x692   :  { %2138 = vlog2.f32 %v1565_v35  ;;  %v1469_v11 = vadd.f32 %v1468_v31, %v1467_v52  ;;  %s2140_s6 = scalar_lea.vmem %s1630_s30, 16  ;;  %s2144_s7 = scalar_lea.vmem %s1630_s30, 32 }
 0x693   :  { %v2127_v25 = vpop.eup %2126  ;;  %v1458_v19 = vmul.f32 %v1450_v7, %v1334_v41  ;;  %v1584_v39 = vsub.f32 0.0, %v1570_v27  ;;  %v1474_v36 = vsel %vm1460_vm2, %v1459_v21, 0.0  ;;  %p2141_p0 = scmp.ne.s32.totalorder %s1630_s30, %s2140_s6  ;;  %p2145_p1 = scmp.lt.s32.totalorder %s1630_s30, %s1630_s30 }
 0x694   :  { %v1568_v17 = vmul.f32 0.6931472, %v2127_v25  ;;  %v1471_v5 = vadd.f32 %v1470_v38, %v1469_v11  ;;  %p2146_p2 = scmp.lt.s32.totalorder %s2144_s7, %s2140_s6 }
 0x695   :  { %v2129_v55 = vpop.eup %2128  ;;  %v1472_v56 = vsel %vm1460_vm2, %v1458_v19, 0.0  ;;  %v1592_v46 = vmul.f32 %v1584_v39, %v1337_v45 }
 0x696   :  { %v1583_v51 = vsub.f32 0.0, %v1568_v17  ;;  %v1574_v30 = vmul.f32 0.6931472, %v2129_v55  ;;  %v1473_v24 = vadd.f32 %v1472_v56, %v1471_v5  ;;  %p2147_p3 = por %p2146_p2, %p2145_p1 }
 0x697   :  { %v2131_v49 = vpop.eup %2130  ;;  %v1600_v62 = vsel %vm1460_vm2, %v1592_v46, 0.0 }
 0x698   :  { %v1591_v42 = vmul.f32 %v1583_v51, %v1336_v48  ;;  %v1586_v0 = vsub.f32 0.0, %v1574_v30  ;;  %v1572_v29 = vmul.f32 0.6931472, %v2131_v49  ;;  %v1475_v40 = vadd.f32 %v1474_v36, %v1473_v24  ;;  %p2148_p4 = pnand %p2147_p3, %p2141_p0 }
 0x699   :  { %v2133_v43 = vpop.eup %2132 }
 0x69a   :  { %v1599_v9 = vsel %vm1460_vm2, %v1591_v42, 0.0  ;;  %v1585_v13 = vsub.f32 0.0, %v1572_v29  ;;  %v1578_v59 = vmul.f32 0.6931472, %v2133_v43  ;;  %v1594_v16 = vmul.f32 %v1586_v0, %v1339_v54 }
 0x69b   :  { %v2135_v57 = vpop.eup %2134  ;;  %v1601_v50 = vadd.f32 %v1600_v62, %v1599_v9  ;;  %v1476_v37 = vrot.slane %v1475_v40, 4 }
 0x69c   :  { %v1593_v8 = vmul.f32 %v1585_v13, %v1338_v61  ;;  %v1588_v14 = vsub.f32 0.0, %v1578_v59  ;;  %v1576_v63 = vmul.f32 0.6931472, %v2135_v57  ;;  %v1604_v33 = vsel %vm1460_vm2, %v1594_v16, 0.0 }
 0x69d   :  { %v2137_v12 = vpop.eup %2136  ;;  %v1477_v52 = vadd.f32 %v1476_v37, %v1475_v40 }
 0x69e   :  { %v1587_v3 = vsub.f32 0.0, %v1576_v63  ;;  %v1582_v47 = vmul.f32 0.6931472, %v2137_v12  ;;  %v1602_v34 = vsel %vm1460_vm2, %v1593_v8, 0.0  ;;  %v1596_v26 = vmul.f32 %v1588_v14, %v1341_v1 }
 0x69f   :  { %v2139_v4 = vpop.eup %2138  ;;  %v1603_v58 = vadd.f32 %v1602_v34, %v1601_v50  ;;  %v1478_v25 = vrot.slane %v1477_v52, 2 }
 0x6a0   :  { %v1580_v10 = vmul.f32 0.6931472, %v2139_v4  ;;  %v1590_v20 = vsub.f32 0.0, %v1582_v47  ;;  %v1595_v22 = vmul.f32 %v1587_v3, %v1340_v44  ;;  %v1608_v32 = vsel %vm1460_vm2, %v1596_v26, 0.0 }
 0x6a1   :  { %v1605_v60 = vadd.f32 %v1604_v33, %v1603_v58  ;;  %v1479_v39 = vadd.f32 %v1478_v25, %v1477_v52 }
 0x6a2   :  { %v1589_v23 = vsub.f32 0.0, %v1580_v10  ;;  %v1606_v18 = vsel %vm1460_vm2, %v1595_v22, 0.0  ;;  %v1598_v41 = vmul.f32 %v1590_v20, %v1343_v15 }
 0x6a3   :  { %v1607_v2 = vadd.f32 %v1606_v18, %v1605_v60  ;;  %v1480_v38 = vrot.slane %v1479_v39, 1 }
 0x6a4   :  { %v1597_v35 = vmul.f32 %v1589_v23, %v1342_v6  ;;  %v1612_v11 = vsel %vm1460_vm2, %v1598_v41, 0.0 }
 0x6a5   :  { %v1609_v27 = vadd.f32 %v1608_v32, %v1607_v2  ;;  %v1481_v48 = vadd.f32 %v1480_v38, %v1479_v39 }
 0x6a6   :  { %v1610_v7 = vsel %vm1460_vm2, %v1597_v35, 0.0 }
 0x6a7   :  { %v1611_v31 = vadd.f32 %v1610_v7, %v1609_v27 }
 0x6a9   :  { %v1613_v53 = vadd.f32 %v1612_v11, %v1611_v31 }
 0x6ab   :  { %v1614_v19 = vrot.slane %v1613_v53, 4 }
 0x6ad   :  { %v1615_v17 = vadd.f32 %v1614_v19, %v1613_v53 }
 0x6af   :  { %v1616_v28 = vrot.slane %v1615_v17, 2 }
 0x6b1   :  { %v1617_v55 = vadd.f32 %v1616_v28, %v1615_v17 }
 0x6b3   :  { %v1618_v45 = vrot.slane %v1617_v55, 1 }
 0x6b5   :  { %v1619_v5 = vadd.f32 %v1618_v45, %v1617_v55 }
 0x6b7   :  { %v1620_v51 = vadd.f32 %v1619_v5, %v1481_v48 }
 0x6b9   :  { %1622 = vst.msk [vmem:[#allocation2] sm:$0x1] %vm1621_vm3, %v1620_v51 }
 0x6ba   :  { %2151 = shalt.err (!%p2148_p4)
}
 0x6bb   :  { %1632 = dma.vmem_to_hbm [thread:$0]  %s1630_s30, 16, %s2814_s5, [#allocation3]  }
 0x6bc   :  { %2160 = dma.done.wait [#allocation3], 16  }
 0x6bd   :  { %2161 = vsyncadd [#allocation3], 4294967280 }
 0x6be   :  { %1636 = vsyncpa [#allocation3], 1 }

</bundles_post_ra>
